<compile_context>
chip_gen: v6e
topology: v6e:2x2x1
jax: 0.10.0
libtpu: 0.0.40
codegen_flags: <defaults>
</compile_context>

<pallas_src>
import functools

import jax
import jax.numpy as jnp
from jax.experimental import pallas as pl
from jax.experimental.pallas import tpu as pltpu


# ---------------------------------------------------------------------------
# In-kernel math helpers
# ---------------------------------------------------------------------------
def _layernorm(x, g, b, eps=1e-5):
    """torch.nn.LayerNorm over the last dim (biased variance, eps=1e-5)."""
    mu = jnp.mean(x, axis=-1, keepdims=True)
    xc = x - mu
    var = jnp.mean(xc * xc, axis=-1, keepdims=True)
    return xc * jax.lax.rsqrt(var + eps) * g + b


def _erf(x):
    # Abramowitz & Stegun 7.1.26 polynomial, max abs error ~1.5e-7, so the
    # kernel matches torch nn.GELU() (exact/erf form) without an erf primitive.
    a1, a2, a3, a4, a5 = 0.254829592, -0.284496736, 1.421413741, -1.453152027, 1.061405429
    p = 0.3275911
    sgn = jnp.where(x < 0.0, -1.0, 1.0)
    ax = jnp.abs(x)
    t = 1.0 / (1.0 + p * ax)
    poly = ((((a5 * t + a4) * t + a3) * t + a2) * t + a1) * t
    return sgn * (1.0 - poly * jnp.exp(-ax * ax))


def _gelu_exact(x):
    return 0.5 * x * (1.0 + _erf(x * 0.7071067811865476))


# ---------------------------------------------------------------------------
# Fused ViT kernel: one grid step == one batch element, full depth unrolled
# ---------------------------------------------------------------------------
def _vit_kernel(
    p_ref,                        # (1, N, PD) patches, row 0 is a zero pad (cls slot)
    wpe_ref, bpe_ref,             # patch embedding     (PD, D), (1, D)
    pos_ref,                      # (1, N, D) pos embedding with cls token folded into row 0
    ln1g_ref, ln1b_ref,           # LayerNorm 1         (depth, 1, D)
    wq_ref, wk_ref, wv_ref,       # Q/K/V projections   (depth, D, inner)
    wo_ref, bo_ref,               # output projection   (depth, inner, D), (depth, 1, D)
    ln2g_ref, ln2b_ref,           # LayerNorm 2         (depth, 1, D)
    w1_ref, b1_ref,               # MLP in              (depth, D, mlp), (depth, 1, mlp)
    w2_ref, b2_ref,               # MLP out             (depth, mlp, D), (depth, 1, D)
    o_ref,                        # (1, 1, D) pooled output
    *, depth, heads, dim_head, scale, pool,
):
    # ---- Patch embedding + cls token + positional embedding ----------------
    pe = jnp.dot(p_ref[0].astype(jnp.float32), wpe_ref[...],
                 preferred_element_type=jnp.float32) + bpe_ref[...]        # (N, D)
    N, D = pe.shape
    inner = heads * dim_head

    is_cls_row = jax.lax.broadcasted_iota(jnp.int32, (N, 1), 0) == 0
    # Row 0 of pos_ref already holds cls_token + pos[0]; the (padded) patch
    # contribution is masked out there, so row 0 == cls + pos[0] exactly.
    x = pos_ref[0].astype(jnp.float32) + jnp.where(is_cls_row, 0.0, pe)
    # TODO(synk): nn.Dropout(emb_dropout) is identity in eval mode; omitted.

    # Per-head lane masks (built once, reused by every layer). Masked lanes
    # contribute exact zeros to the MXU contraction, so masked full-width
    # matmuls equal the per-head sliced matmuls bit-for-bit.
    lane = jax.lax.broadcasted_iota(jnp.int32, (N, inner), 1)
    head_masks = [(lane >= h * dim_head) & (lane < (h + 1) * dim_head)
                  for h in range(heads)]

    # ---- Transformer layers (static unroll over depth) ---------------------
    for l in range(depth):
        # PreNorm + multi-head attention + residual
        xn = _layernorm(x, ln1g_ref[l], ln1b_ref[l])
        q = jnp.dot(xn, wq_ref[l], preferred_element_type=jnp.float32) * scale
        k = jnp.dot(xn, wk_ref[l], preferred_element_type=jnp.float32)
        v = jnp.dot(xn, wv_ref[l], preferred_element_type=jnp.float32)

        out_cat = jnp.zeros((N, inner), jnp.float32)   # lane-concatenated heads
        for h in range(heads):                          # static unroll over heads
            qh = jnp.where(head_masks[h], q, 0.0)
            # s = q_h @ k_h^T : masked-q against full k contracts only over
            # head-h lanes; transpose absorbed into the MXU contraction.
            s = jax.lax.dot_general(qh, k, (((1,), (1,)), ((), ())),
                                    preferred_element_type=jnp.float32)    # (N, N)
            s = s - jnp.max(s, axis=-1, keepdims=True)
            p = jnp.exp(s)
            p = p / jnp.sum(p, axis=-1, keepdims=True)  # exact softmax (parity)
            vh = jnp.where(head_masks[h], v, 0.0)
            # p @ v_h lands directly in head-h's lane block of out_cat.
            out_cat = out_cat + jnp.dot(p, vh, preferred_element_type=jnp.float32)

        x = x + jnp.dot(out_cat, wo_ref[l], preferred_element_type=jnp.float32) + bo_ref[l]
        # TODO(synk): nn.Dropout(dropout) after to_out is identity in eval mode.

        # PreNorm + FeedForward (Linear -> GELU -> Linear) + residual
        xn2 = _layernorm(x, ln2g_ref[l], ln2b_ref[l])
        hdn = _gelu_exact(jnp.dot(xn2, w1_ref[l], preferred_element_type=jnp.float32)
                          + b1_ref[l])
        x = x + jnp.dot(hdn, w2_ref[l], preferred_element_type=jnp.float32) + b2_ref[l]

    # ---- Pool + store (single lane-masked store per batch element) ---------
    if pool == "mean":
        o_ref[0] = jnp.mean(x, axis=0, keepdims=True).astype(o_ref.dtype)
    else:
        o_ref[0] = x[:1, :].astype(o_ref.dtype)        # cls row


# ---------------------------------------------------------------------------
# pallas_call wrapper (all layout glue is trace-time / plain JAX)
# ---------------------------------------------------------------------------
def vit_forward(img, params, *, heads, dim_head, patch_size, pool="cls"):
    B, C, H, W = img.shape
    ph = pw = patch_size
    gh, gw = H // ph, W // pw
    P = gh * gw
    PD = ph * pw * C

    # einops 'b c (h p1) (w p2) -> b (h w) (p1 p2 c)'  (pure layout glue),
    # plus a zero row at index 0 so the sequence is uniformly N = P + 1 long.
    patches = img.reshape(B, C, gh, ph, gw, pw)
    patches = jnp.transpose(patches, (0, 2, 4, 3, 5, 1)).reshape(B, P, PD)
    patches = jnp.concatenate([jnp.zeros((B, 1, PD), patches.dtype), patches], axis=1)
    N = P + 1

    D = params["w_pe"].shape[1]
    depth = params["w_qkv"].shape[0]
    inner = heads * dim_head
    mlp = params["w1"].shape[-1]

    # Fold the cls token into row 0 of the positional embedding (trace time).
    pos = params["pos"][:, :N]
    pos = pos.at[:, 0, :].add(params["cls"][0, 0])

    # Split fused QKV weights into lane-dense per-projection stacks.
    wq = params["w_qkv"][:, :, :inner]
    wk = params["w_qkv"][:, :, inner:2 * inner]
    wv = params["w_qkv"][:, :, 2 * inner:]

    kern = functools.partial(_vit_kernel, depth=depth, heads=heads,
                             dim_head=dim_head, scale=float(dim_head) ** -0.5,
                             pool=pool)

    def rep(shape):   # weight/const blocks: same full block for every grid step
        nd = len(shape)
        return pl.BlockSpec(shape, lambda b, _nd=nd: (0,) * _nd)

    out = pl.pallas_call(
        kern,
        out_shape=jax.ShapeDtypeStruct((B, 1, D), img.dtype),
        grid=(B,),
        in_specs=[
            pl.BlockSpec((1, N, PD), lambda b: (b, 0, 0)),   # patches (per batch)
            rep((PD, D)), rep((1, D)),                       # w_pe, b_pe
            rep((1, N, D)),                                  # pos (+cls)
            rep((depth, 1, D)), rep((depth, 1, D)),          # ln1 gamma/beta
            rep((depth, D, inner)), rep((depth, D, inner)), rep((depth, D, inner)),
            rep((depth, inner, D)), rep((depth, 1, D)),      # w_out, b_out
            rep((depth, 1, D)), rep((depth, 1, D)),          # ln2 gamma/beta
            rep((depth, D, mlp)), rep((depth, 1, mlp)),      # w1, b1
            rep((depth, mlp, D)), rep((depth, 1, D)),        # w2, b2
        ],
        out_specs=pl.BlockSpec((1, 1, D), lambda b: (b, 0, 0)),
        compiler_params=pltpu.CompilerParams(dimension_semantics=("parallel",)),
    )(patches, params["w_pe"], params["b_pe"], pos,
      params["ln1_g"], params["ln1_b"], wq, wk, wv,
      params["w_out"], params["b_out"],
      params["ln2_g"], params["ln2_b"],
      params["w1"], params["b1"], params["w2"], params["b2"])

    return out[:, 0, :]                                     # to_latent = Identity


# ---------------------------------------------------------------------------
# Pure-JAX reference (mirrors the torch module) for correctness checking
# ---------------------------------------------------------------------------
def vit_ref(img, params, *, heads, dim_head, patch_size, pool="cls"):
    HI = jax.lax.Precision.HIGHEST
    B, C, H, W = img.shape
    ph = pw = patch_size
    gh, gw = H // ph, W // pw
    x = img.reshape(B, C, gh, ph, gw, pw)
    x = jnp.transpose(x, (0, 2, 4, 3, 5, 1)).reshape(B, gh * gw, ph * pw * C)
    x = jnp.dot(x, params["w_pe"], precision=HI) + params["b_pe"]
    D = x.shape[-1]
    n = x.shape[1]
    cls = jnp.broadcast_to(params["cls"], (B, 1, D))
    x = jnp.concatenate([cls, x], axis=1) + params["pos"][:, : n + 1]

    inner = heads * dim_head
    scale = dim_head ** (-0.5)
    depth = params["w_qkv"].shape[0]
    for l in range(depth):
        xn = _layernorm(x, params["ln1_g"][l], params["ln1_b"][l])
        qkv = jnp.dot(xn, params["w_qkv"][l], precision=HI)
        q, k, v = jnp.split(qkv, 3, axis=-1)
        to_heads = lambda t: jnp.transpose(t.reshape(B, -1, heads, dim_head), (0, 2, 1, 3))
        q, k, v = to_heads(q), to_heads(k), to_heads(v)
        dots = jnp.einsum("bhid,bhjd->bhij", q, k, precision=HI) * scale
        attn = jax.nn.softmax(dots, axis=-1)
        out = jnp.einsum("bhij,bhjd->bhid", attn, v, precision=HI)
        out = jnp.transpose(out, (0, 2, 1, 3)).reshape(B, -1, inner)
        x = jnp.dot(out, params["w_out"][l], precision=HI) + params["b_out"][l] + x
        xn2 = _layernorm(x, params["ln2_g"][l], params["ln2_b"][l])
        hdn = jax.nn.gelu(jnp.dot(xn2, params["w1"][l], precision=HI) + params["b1"][l],
                          approximate=False)
        x = jnp.dot(hdn, params["w2"][l], precision=HI) + params["b2"][l] + x
    return jnp.mean(x, axis=1) if pool == "mean" else x[:, 0]


# ---------------------------------------------------------------------------
if __name__ == "__main__":
    # Small shapes consistent with the module: image 16x16, patch 8, dim=32,
    # depth=2, heads=4, dim_head=16, mlp_dim=64, channels=1, pool='cls'.
    B, CH, IMG, PATCH = 2, 1, 16, 8
    DIM, DEPTH, HEADS, DIM_HEAD, MLP = 32, 2, 4, 16, 64
    INNER = HEADS * DIM_HEAD
    NUM_PATCHES = (IMG // PATCH) * (IMG // PATCH)
    PATCH_DIM = CH * PATCH * PATCH
    SEQ = NUM_PATCHES + 1

    key = jax.random.PRNGKey(0)
    keys = iter(jax.random.split(key, 24))

    def nrm(shape, s):
        return jax.random.normal(next(keys), shape, dtype=jnp.float32) * s

    params = {
        "w_pe": nrm((PATCH_DIM, DIM), 0.1),
        "b_pe": nrm((1, DIM), 0.1),
        "cls": nrm((1, 1, DIM), 1.0),
        "pos": nrm((1, SEQ, DIM), 1.0),
        # Transformer layer weights stacked along a leading depth axis.
        "ln1_g": 1.0 + nrm((DEPTH, 1, DIM), 0.05),
        "ln1_b": nrm((DEPTH, 1, DIM), 0.05),
        "w_qkv": nrm((DEPTH, DIM, 3 * INNER), 0.15),
        "w_out": nrm((DEPTH, INNER, DIM), 0.15),
        "b_out": nrm((DEPTH, 1, DIM), 0.05),
        "ln2_g": 1.0 + nrm((DEPTH, 1, DIM), 0.05),
        "ln2_b": nrm((DEPTH, 1, DIM), 0.05),
        "w1": nrm((DEPTH, DIM, MLP), 0.15),
        "b1": nrm((DEPTH, 1, MLP), 0.05),
        "w2": nrm((DEPTH, MLP, DIM), 0.15),
        "b2": nrm((DEPTH, 1, DIM), 0.05),
    }

    img = jax.random.normal(next(keys), (B, CH, IMG, IMG), dtype=jnp.float32)

    fwd = jax.jit(functools.partial(vit_forward, heads=HEADS, dim_head=DIM_HEAD,
                                    patch_size=PATCH, pool="cls"))
    y = jax.block_until_ready(fwd(img, params))

    y_ref = vit_ref(img, params, heads=HEADS, dim_head=DIM_HEAD,
                    patch_size=PATCH, pool="cls")

    assert y.shape == (B, DIM)
    assert jnp.allclose(y, y_ref, atol=1e-3, rtol=1e-3), float(jnp.max(jnp.abs(y - y_ref)))
    print("KERNEL_OK")
</pallas_src>

<mosaic_0001>
module attributes {stable_mosaic.version = 11 : i64} {
  func.func @_vit_kernel(%arg0: i32, %arg1: memref<1x5x64xf32, #tpu.memory_space<vmem>>, %arg2: memref<64x32xf32, #tpu.memory_space<vmem>>, %arg3: memref<1x32xf32, #tpu.memory_space<vmem>>, %arg4: memref<1x5x32xf32, #tpu.memory_space<vmem>>, %arg5: memref<2x1x32xf32, #tpu.memory_space<vmem>>, %arg6: memref<2x1x32xf32, #tpu.memory_space<vmem>>, %arg7: memref<2x32x64xf32, #tpu.memory_space<vmem>>, %arg8: memref<2x32x64xf32, #tpu.memory_space<vmem>>, %arg9: memref<2x32x64xf32, #tpu.memory_space<vmem>>, %arg10: memref<2x64x32xf32, #tpu.memory_space<vmem>>, %arg11: memref<2x1x32xf32, #tpu.memory_space<vmem>>, %arg12: memref<2x1x32xf32, #tpu.memory_space<vmem>>, %arg13: memref<2x1x32xf32, #tpu.memory_space<vmem>>, %arg14: memref<2x32x64xf32, #tpu.memory_space<vmem>>, %arg15: memref<2x1x64xf32, #tpu.memory_space<vmem>>, %arg16: memref<2x64x32xf32, #tpu.memory_space<vmem>>, %arg17: memref<2x1x32xf32, #tpu.memory_space<vmem>>, %arg18: memref<1x1x32xf32, #tpu.memory_space<vmem>>) attributes {dimension_semantics = [#tpu.dimension_semantics<parallel>], iteration_bounds = array<i64: 2>, scalar_prefetch = 0 : i64, scratch_operands = 0 : i64, tpu.core_type = #tpu.core_type<tc>, window_params = [{transform_indices = @transform_0, window_bounds = array<i64: 1, 5, 64>}, {pipeline_mode = #tpu.pipeline_mode<synchronous>, transform_indices = @transform_1, window_bounds = array<i64: 64, 32>}, {pipeline_mode = #tpu.pipeline_mode<synchronous>, transform_indices = @transform_2, window_bounds = array<i64: 1, 32>}, {pipeline_mode = #tpu.pipeline_mode<synchronous>, transform_indices = @transform_3, window_bounds = array<i64: 1, 5, 32>}, {pipeline_mode = #tpu.pipeline_mode<synchronous>, transform_indices = @transform_4, window_bounds = array<i64: 2, 1, 32>}, {pipeline_mode = #tpu.pipeline_mode<synchronous>, transform_indices = @transform_5, window_bounds = array<i64: 2, 1, 32>}, {pipeline_mode = #tpu.pipeline_mode<synchronous>, transform_indices = @transform_6, window_bounds = array<i64: 2, 32, 64>}, {pipeline_mode = #tpu.pipeline_mode<synchronous>, transform_indices = @transform_7, window_bounds = array<i64: 2, 32, 64>}, {pipeline_mode = #tpu.pipeline_mode<synchronous>, transform_indices = @transform_8, window_bounds = array<i64: 2, 32, 64>}, {pipeline_mode = #tpu.pipeline_mode<synchronous>, transform_indices = @transform_9, window_bounds = array<i64: 2, 64, 32>}, {pipeline_mode = #tpu.pipeline_mode<synchronous>, transform_indices = @transform_10, window_bounds = array<i64: 2, 1, 32>}, {pipeline_mode = #tpu.pipeline_mode<synchronous>, transform_indices = @transform_11, window_bounds = array<i64: 2, 1, 32>}, {pipeline_mode = #tpu.pipeline_mode<synchronous>, transform_indices = @transform_12, window_bounds = array<i64: 2, 1, 32>}, {pipeline_mode = #tpu.pipeline_mode<synchronous>, transform_indices = @transform_13, window_bounds = array<i64: 2, 32, 64>}, {pipeline_mode = #tpu.pipeline_mode<synchronous>, transform_indices = @transform_14, window_bounds = array<i64: 2, 1, 64>}, {pipeline_mode = #tpu.pipeline_mode<synchronous>, transform_indices = @transform_15, window_bounds = array<i64: 2, 64, 32>}, {pipeline_mode = #tpu.pipeline_mode<synchronous>, transform_indices = @transform_16, window_bounds = array<i64: 2, 1, 32>}, {transform_indices = @transform_17, window_bounds = array<i64: 1, 1, 32>}]} {
    %c0 = arith.constant 0 : index
    %c0_0 = arith.constant 0 : index
    %c0_1 = arith.constant 0 : index
    %0 = vector.load %arg1[%c0, %c0_0, %c0_1] : memref<1x5x64xf32, #tpu.memory_space<vmem>>, vector<1x5x64xf32>
    %1 = vector.shape_cast %0 : vector<1x5x64xf32> to vector<5x64xf32>
    %c0_2 = arith.constant 0 : index
    %c0_3 = arith.constant 0 : index
    %2 = vector.load %arg2[%c0_2, %c0_3] : memref<64x32xf32, #tpu.memory_space<vmem>>, vector<64x32xf32>
    %cst = arith.constant dense<0.000000e+00> : vector<5x32xf32>
    %3 = tpu.matmul %1, %2, %cst {dimension_numbers = #tpu.dot_dimension_numbers<[1], [0], [0], [1], [0, 0, 1, 1], [], []>} : vector<5x64xf32>, vector<64x32xf32>, vector<5x32xf32> -> vector<5x32xf32>
    %c0_4 = arith.constant 0 : index
    %c0_5 = arith.constant 0 : index
    %4 = vector.load %arg3[%c0_4, %c0_5] : memref<1x32xf32, #tpu.memory_space<vmem>>, vector<1x32xf32>
    %5 = vector.broadcast %4 : vector<1x32xf32> to vector<5x32xf32>
    %6 = arith.addf %3, %5 : vector<5x32xf32>
    %7 = tpu.iota {dimensions = array<i32: 0>} : vector<5x1xi32>
    %c0_i32 = arith.constant 0 : i32
    %8 = vector.broadcast %c0_i32 : i32 to vector<5x1xi32>
    %9 = arith.cmpi eq, %7, %8 : vector<5x1xi32>
    %c0_6 = arith.constant 0 : index
    %c0_7 = arith.constant 0 : index
    %c0_8 = arith.constant 0 : index
    %10 = vector.load %arg4[%c0_6, %c0_7, %c0_8] : memref<1x5x32xf32, #tpu.memory_space<vmem>>, vector<1x5x32xf32>
    %11 = vector.shape_cast %10 : vector<1x5x32xf32> to vector<5x32xf32>
    %cst_9 = arith.constant 0.000000e+00 : f32
    %12 = vector.shape_cast %9 : vector<5x1xi1> to vector<5x1xi1>
    %13 = vector.broadcast %12 : vector<5x1xi1> to vector<5x32xi1>
    %14 = vector.broadcast %cst_9 : f32 to vector<5x32xf32>
    %15 = arith.select %13, %14, %6 : vector<5x32xi1>, vector<5x32xf32>
    %16 = arith.addf %11, %15 : vector<5x32xf32>
    %17 = tpu.iota {dimensions = array<i32: 1>} : vector<5x64xi32>
    %c0_i32_10 = arith.constant 0 : i32
    %18 = vector.broadcast %c0_i32_10 : i32 to vector<5x64xi32>
    %19 = arith.cmpi sge, %17, %18 : vector<5x64xi32>
    %c16_i32 = arith.constant 16 : i32
    %20 = vector.broadcast %c16_i32 : i32 to vector<5x64xi32>
    %21 = arith.cmpi slt, %17, %20 : vector<5x64xi32>
    %22 = arith.andi %19, %21 : vector<5x64xi1>
    %c16_i32_11 = arith.constant 16 : i32
    %23 = vector.broadcast %c16_i32_11 : i32 to vector<5x64xi32>
    %24 = arith.cmpi sge, %17, %23 : vector<5x64xi32>
    %c32_i32 = arith.constant 32 : i32
    %25 = vector.broadcast %c32_i32 : i32 to vector<5x64xi32>
    %26 = arith.cmpi slt, %17, %25 : vector<5x64xi32>
    %27 = arith.andi %24, %26 : vector<5x64xi1>
    %c32_i32_12 = arith.constant 32 : i32
    %28 = vector.broadcast %c32_i32_12 : i32 to vector<5x64xi32>
    %29 = arith.cmpi sge, %17, %28 : vector<5x64xi32>
    %c48_i32 = arith.constant 48 : i32
    %30 = vector.broadcast %c48_i32 : i32 to vector<5x64xi32>
    %31 = arith.cmpi slt, %17, %30 : vector<5x64xi32>
    %32 = arith.andi %29, %31 : vector<5x64xi1>
    %c48_i32_13 = arith.constant 48 : i32
    %33 = vector.broadcast %c48_i32_13 : i32 to vector<5x64xi32>
    %34 = arith.cmpi sge, %17, %33 : vector<5x64xi32>
    %c64_i32 = arith.constant 64 : i32
    %35 = vector.broadcast %c64_i32 : i32 to vector<5x64xi32>
    %36 = arith.cmpi slt, %17, %35 : vector<5x64xi32>
    %37 = arith.andi %34, %36 : vector<5x64xi1>
    %c0_14 = arith.constant 0 : index
    %c0_15 = arith.constant 0 : index
    %c0_16 = arith.constant 0 : index
    %38 = vector.load %arg5[%c0_14, %c0_15, %c0_16] : memref<2x1x32xf32, #tpu.memory_space<vmem>>, vector<1x1x32xf32>
    %39 = vector.shape_cast %38 : vector<1x1x32xf32> to vector<1x32xf32>
    %c0_17 = arith.constant 0 : index
    %c0_18 = arith.constant 0 : index
    %c0_19 = arith.constant 0 : index
    %40 = vector.load %arg6[%c0_17, %c0_18, %c0_19] : memref<2x1x32xf32, #tpu.memory_space<vmem>>, vector<1x1x32xf32>
    %41 = vector.shape_cast %40 : vector<1x1x32xf32> to vector<1x32xf32>
    %cst_20 = arith.constant dense<0.000000e+00> : vector<5xf32>
    %42 = vector.multi_reduction <add>, %16, %cst_20 [1] : vector<5x32xf32> to vector<5xf32>
    %43 = vector.shape_cast %42 : vector<5xf32> to vector<5x1xf32>
    %cst_21 = arith.constant 3.200000e+01 : f32
    %44 = vector.broadcast %cst_21 : f32 to vector<5x1xf32>
    %45 = arith.divf %43, %44 : vector<5x1xf32>
    %46 = vector.broadcast %45 : vector<5x1xf32> to vector<5x32xf32>
    %47 = arith.subf %16, %46 : vector<5x32xf32>
    %48 = arith.mulf %47, %47 : vector<5x32xf32>
    %cst_22 = arith.constant dense<0.000000e+00> : vector<5xf32>
    %49 = vector.multi_reduction <add>, %48, %cst_22 [1] : vector<5x32xf32> to vector<5xf32>
    %50 = vector.shape_cast %49 : vector<5xf32> to vector<5x1xf32>
    %cst_23 = arith.constant 3.200000e+01 : f32
    %51 = vector.broadcast %cst_23 : f32 to vector<5x1xf32>
    %52 = arith.divf %50, %51 : vector<5x1xf32>
    %cst_24 = arith.constant 9.99999974E-6 : f32
    %53 = vector.broadcast %cst_24 : f32 to vector<5x1xf32>
    %54 = arith.addf %52, %53 : vector<5x1xf32>
    %55 = math.rsqrt %54 : vector<5x1xf32>
    %56 = vector.broadcast %55 : vector<5x1xf32> to vector<5x32xf32>
    %57 = arith.mulf %47, %56 : vector<5x32xf32>
    %58 = vector.broadcast %39 : vector<1x32xf32> to vector<5x32xf32>
    %59 = arith.mulf %57, %58 : vector<5x32xf32>
    %60 = vector.broadcast %41 : vector<1x32xf32> to vector<5x32xf32>
    %61 = arith.addf %59, %60 : vector<5x32xf32>
    %c0_25 = arith.constant 0 : index
    %c0_26 = arith.constant 0 : index
    %c0_27 = arith.constant 0 : index
    %62 = vector.load %arg7[%c0_25, %c0_26, %c0_27] : memref<2x32x64xf32, #tpu.memory_space<vmem>>, vector<1x32x64xf32>
    %63 = vector.shape_cast %62 : vector<1x32x64xf32> to vector<32x64xf32>
    %cst_28 = arith.constant dense<0.000000e+00> : vector<5x64xf32>
    %64 = tpu.matmul %61, %63, %cst_28 {dimension_numbers = #tpu.dot_dimension_numbers<[1], [0], [0], [1], [0, 0, 1, 1], [], []>} : vector<5x32xf32>, vector<32x64xf32>, vector<5x64xf32> -> vector<5x64xf32>
    %cst_29 = arith.constant 2.500000e-01 : f32
    %65 = vector.broadcast %cst_29 : f32 to vector<5x64xf32>
    %66 = arith.mulf %64, %65 : vector<5x64xf32>
    %c0_30 = arith.constant 0 : index
    %c0_31 = arith.constant 0 : index
    %c0_32 = arith.constant 0 : index
    %67 = vector.load %arg8[%c0_30, %c0_31, %c0_32] : memref<2x32x64xf32, #tpu.memory_space<vmem>>, vector<1x32x64xf32>
    %68 = vector.shape_cast %67 : vector<1x32x64xf32> to vector<32x64xf32>
    %cst_33 = arith.constant dense<0.000000e+00> : vector<5x64xf32>
    %69 = tpu.matmul %61, %68, %cst_33 {dimension_numbers = #tpu.dot_dimension_numbers<[1], [0], [0], [1], [0, 0, 1, 1], [], []>} : vector<5x32xf32>, vector<32x64xf32>, vector<5x64xf32> -> vector<5x64xf32>
    %c0_34 = arith.constant 0 : index
    %c0_35 = arith.constant 0 : index
    %c0_36 = arith.constant 0 : index
    %70 = vector.load %arg9[%c0_34, %c0_35, %c0_36] : memref<2x32x64xf32, #tpu.memory_space<vmem>>, vector<1x32x64xf32>
    %71 = vector.shape_cast %70 : vector<1x32x64xf32> to vector<32x64xf32>
    %cst_37 = arith.constant dense<0.000000e+00> : vector<5x64xf32>
    %72 = tpu.matmul %61, %71, %cst_37 {dimension_numbers = #tpu.dot_dimension_numbers<[1], [0], [0], [1], [0, 0, 1, 1], [], []>} : vector<5x32xf32>, vector<32x64xf32>, vector<5x64xf32> -> vector<5x64xf32>
    %cst_38 = arith.constant 0.000000e+00 : f32
    %73 = vector.broadcast %cst_38 : f32 to vector<5x64xf32>
    %cst_39 = arith.constant 0.000000e+00 : f32
    %74 = vector.broadcast %cst_39 : f32 to vector<5x64xf32>
    %75 = arith.select %22, %66, %74 : vector<5x64xi1>, vector<5x64xf32>
    %cst_40 = arith.constant dense<0.000000e+00> : vector<5x5xf32>
    %76 = tpu.matmul %75, %69, %cst_40 {dimension_numbers = #tpu.dot_dimension_numbers<[1], [1], [0], [0], [0, 0, 1, 0], [], []>} : vector<5x64xf32>, vector<5x64xf32>, vector<5x5xf32> -> vector<5x5xf32>
    %cst_41 = arith.constant dense<0xFF800000> : vector<5xf32>
    %77 = vector.multi_reduction <maximumf>, %76, %cst_41 [1] : vector<5x5xf32> to vector<5xf32>
    %78 = vector.shape_cast %77 : vector<5xf32> to vector<5x1xf32>
    %79 = vector.broadcast %78 : vector<5x1xf32> to vector<5x5xf32>
    %80 = arith.subf %76, %79 : vector<5x5xf32>
    %81 = math.exp %80 : vector<5x5xf32>
    %cst_42 = arith.constant dense<0.000000e+00> : vector<5xf32>
    %82 = vector.multi_reduction <add>, %81, %cst_42 [1] : vector<5x5xf32> to vector<5xf32>
    %83 = vector.shape_cast %82 : vector<5xf32> to vector<5x1xf32>
    %84 = vector.broadcast %83 : vector<5x1xf32> to vector<5x5xf32>
    %85 = arith.divf %81, %84 : vector<5x5xf32>
    %cst_43 = arith.constant 0.000000e+00 : f32
    %86 = vector.broadcast %cst_43 : f32 to vector<5x64xf32>
    %87 = arith.select %22, %72, %86 : vector<5x64xi1>, vector<5x64xf32>
    %cst_44 = arith.constant dense<0.000000e+00> : vector<5x64xf32>
    %88 = tpu.matmul %85, %87, %cst_44 {dimension_numbers = #tpu.dot_dimension_numbers<[1], [0], [0], [1], [0, 0, 1, 1], [], []>} : vector<5x5xf32>, vector<5x64xf32>, vector<5x64xf32> -> vector<5x64xf32>
    %89 = arith.addf %73, %88 : vector<5x64xf32>
    %cst_45 = arith.constant 0.000000e+00 : f32
    %90 = vector.broadcast %cst_45 : f32 to vector<5x64xf32>
    %91 = arith.select %27, %66, %90 : vector<5x64xi1>, vector<5x64xf32>
    %cst_46 = arith.constant dense<0.000000e+00> : vector<5x5xf32>
    %92 = tpu.matmul %91, %69, %cst_46 {dimension_numbers = #tpu.dot_dimension_numbers<[1], [1], [0], [0], [0, 0, 1, 0], [], []>} : vector<5x64xf32>, vector<5x64xf32>, vector<5x5xf32> -> vector<5x5xf32>
    %cst_47 = arith.constant dense<0xFF800000> : vector<5xf32>
    %93 = vector.multi_reduction <maximumf>, %92, %cst_47 [1] : vector<5x5xf32> to vector<5xf32>
    %94 = vector.shape_cast %93 : vector<5xf32> to vector<5x1xf32>
    %95 = vector.broadcast %94 : vector<5x1xf32> to vector<5x5xf32>
    %96 = arith.subf %92, %95 : vector<5x5xf32>
    %97 = math.exp %96 : vector<5x5xf32>
    %cst_48 = arith.constant dense<0.000000e+00> : vector<5xf32>
    %98 = vector.multi_reduction <add>, %97, %cst_48 [1] : vector<5x5xf32> to vector<5xf32>
    %99 = vector.shape_cast %98 : vector<5xf32> to vector<5x1xf32>
    %100 = vector.broadcast %99 : vector<5x1xf32> to vector<5x5xf32>
    %101 = arith.divf %97, %100 : vector<5x5xf32>
    %cst_49 = arith.constant 0.000000e+00 : f32
    %102 = vector.broadcast %cst_49 : f32 to vector<5x64xf32>
    %103 = arith.select %27, %72, %102 : vector<5x64xi1>, vector<5x64xf32>
    %cst_50 = arith.constant dense<0.000000e+00> : vector<5x64xf32>
    %104 = tpu.matmul %101, %103, %cst_50 {dimension_numbers = #tpu.dot_dimension_numbers<[1], [0], [0], [1], [0, 0, 1, 1], [], []>} : vector<5x5xf32>, vector<5x64xf32>, vector<5x64xf32> -> vector<5x64xf32>
    %105 = arith.addf %89, %104 : vector<5x64xf32>
    %cst_51 = arith.constant 0.000000e+00 : f32
    %106 = vector.broadcast %cst_51 : f32 to vector<5x64xf32>
    %107 = arith.select %32, %66, %106 : vector<5x64xi1>, vector<5x64xf32>
    %cst_52 = arith.constant dense<0.000000e+00> : vector<5x5xf32>
    %108 = tpu.matmul %107, %69, %cst_52 {dimension_numbers = #tpu.dot_dimension_numbers<[1], [1], [0], [0], [0, 0, 1, 0], [], []>} : vector<5x64xf32>, vector<5x64xf32>, vector<5x5xf32> -> vector<5x5xf32>
    %cst_53 = arith.constant dense<0xFF800000> : vector<5xf32>
    %109 = vector.multi_reduction <maximumf>, %108, %cst_53 [1] : vector<5x5xf32> to vector<5xf32>
    %110 = vector.shape_cast %109 : vector<5xf32> to vector<5x1xf32>
    %111 = vector.broadcast %110 : vector<5x1xf32> to vector<5x5xf32>
    %112 = arith.subf %108, %111 : vector<5x5xf32>
    %113 = math.exp %112 : vector<5x5xf32>
    %cst_54 = arith.constant dense<0.000000e+00> : vector<5xf32>
    %114 = vector.multi_reduction <add>, %113, %cst_54 [1] : vector<5x5xf32> to vector<5xf32>
    %115 = vector.shape_cast %114 : vector<5xf32> to vector<5x1xf32>
    %116 = vector.broadcast %115 : vector<5x1xf32> to vector<5x5xf32>
    %117 = arith.divf %113, %116 : vector<5x5xf32>
    %cst_55 = arith.constant 0.000000e+00 : f32
    %118 = vector.broadcast %cst_55 : f32 to vector<5x64xf32>
    %119 = arith.select %32, %72, %118 : vector<5x64xi1>, vector<5x64xf32>
    %cst_56 = arith.constant dense<0.000000e+00> : vector<5x64xf32>
    %120 = tpu.matmul %117, %119, %cst_56 {dimension_numbers = #tpu.dot_dimension_numbers<[1], [0], [0], [1], [0, 0, 1, 1], [], []>} : vector<5x5xf32>, vector<5x64xf32>, vector<5x64xf32> -> vector<5x64xf32>
    %121 = arith.addf %105, %120 : vector<5x64xf32>
    %cst_57 = arith.constant 0.000000e+00 : f32
    %122 = vector.broadcast %cst_57 : f32 to vector<5x64xf32>
    %123 = arith.select %37, %66, %122 : vector<5x64xi1>, vector<5x64xf32>
    %cst_58 = arith.constant dense<0.000000e+00> : vector<5x5xf32>
    %124 = tpu.matmul %123, %69, %cst_58 {dimension_numbers = #tpu.dot_dimension_numbers<[1], [1], [0], [0], [0, 0, 1, 0], [], []>} : vector<5x64xf32>, vector<5x64xf32>, vector<5x5xf32> -> vector<5x5xf32>
    %cst_59 = arith.constant dense<0xFF800000> : vector<5xf32>
    %125 = vector.multi_reduction <maximumf>, %124, %cst_59 [1] : vector<5x5xf32> to vector<5xf32>
    %126 = vector.shape_cast %125 : vector<5xf32> to vector<5x1xf32>
    %127 = vector.broadcast %126 : vector<5x1xf32> to vector<5x5xf32>
    %128 = arith.subf %124, %127 : vector<5x5xf32>
    %129 = math.exp %128 : vector<5x5xf32>
    %cst_60 = arith.constant dense<0.000000e+00> : vector<5xf32>
    %130 = vector.multi_reduction <add>, %129, %cst_60 [1] : vector<5x5xf32> to vector<5xf32>
    %131 = vector.shape_cast %130 : vector<5xf32> to vector<5x1xf32>
    %132 = vector.broadcast %131 : vector<5x1xf32> to vector<5x5xf32>
    %133 = arith.divf %129, %132 : vector<5x5xf32>
    %cst_61 = arith.constant 0.000000e+00 : f32
    %134 = vector.broadcast %cst_61 : f32 to vector<5x64xf32>
    %135 = arith.select %37, %72, %134 : vector<5x64xi1>, vector<5x64xf32>
    %cst_62 = arith.constant dense<0.000000e+00> : vector<5x64xf32>
    %136 = tpu.matmul %133, %135, %cst_62 {dimension_numbers = #tpu.dot_dimension_numbers<[1], [0], [0], [1], [0, 0, 1, 1], [], []>} : vector<5x5xf32>, vector<5x64xf32>, vector<5x64xf32> -> vector<5x64xf32>
    %137 = arith.addf %121, %136 : vector<5x64xf32>
    %c0_63 = arith.constant 0 : index
    %c0_64 = arith.constant 0 : index
    %c0_65 = arith.constant 0 : index
    %138 = vector.load %arg10[%c0_63, %c0_64, %c0_65] : memref<2x64x32xf32, #tpu.memory_space<vmem>>, vector<1x64x32xf32>
    %139 = vector.shape_cast %138 : vector<1x64x32xf32> to vector<64x32xf32>
    %cst_66 = arith.constant dense<0.000000e+00> : vector<5x32xf32>
    %140 = tpu.matmul %137, %139, %cst_66 {dimension_numbers = #tpu.dot_dimension_numbers<[1], [0], [0], [1], [0, 0, 1, 1], [], []>} : vector<5x64xf32>, vector<64x32xf32>, vector<5x32xf32> -> vector<5x32xf32>
    %141 = arith.addf %16, %140 : vector<5x32xf32>
    %c0_67 = arith.constant 0 : index
    %c0_68 = arith.constant 0 : index
    %c0_69 = arith.constant 0 : index
    %142 = vector.load %arg11[%c0_67, %c0_68, %c0_69] : memref<2x1x32xf32, #tpu.memory_space<vmem>>, vector<1x1x32xf32>
    %143 = vector.shape_cast %142 : vector<1x1x32xf32> to vector<1x32xf32>
    %144 = vector.broadcast %143 : vector<1x32xf32> to vector<5x32xf32>
    %145 = arith.addf %141, %144 : vector<5x32xf32>
    %c0_70 = arith.constant 0 : index
    %c0_71 = arith.constant 0 : index
    %c0_72 = arith.constant 0 : index
    %146 = vector.load %arg12[%c0_70, %c0_71, %c0_72] : memref<2x1x32xf32, #tpu.memory_space<vmem>>, vector<1x1x32xf32>
    %147 = vector.shape_cast %146 : vector<1x1x32xf32> to vector<1x32xf32>
    %c0_73 = arith.constant 0 : index
    %c0_74 = arith.constant 0 : index
    %c0_75 = arith.constant 0 : index
    %148 = vector.load %arg13[%c0_73, %c0_74, %c0_75] : memref<2x1x32xf32, #tpu.memory_space<vmem>>, vector<1x1x32xf32>
    %149 = vector.shape_cast %148 : vector<1x1x32xf32> to vector<1x32xf32>
    %cst_76 = arith.constant dense<0.000000e+00> : vector<5xf32>
    %150 = vector.multi_reduction <add>, %145, %cst_76 [1] : vector<5x32xf32> to vector<5xf32>
    %151 = vector.shape_cast %150 : vector<5xf32> to vector<5x1xf32>
    %cst_77 = arith.constant 3.200000e+01 : f32
    %152 = vector.broadcast %cst_77 : f32 to vector<5x1xf32>
    %153 = arith.divf %151, %152 : vector<5x1xf32>
    %154 = vector.broadcast %153 : vector<5x1xf32> to vector<5x32xf32>
    %155 = arith.subf %145, %154 : vector<5x32xf32>
    %156 = arith.mulf %155, %155 : vector<5x32xf32>
    %cst_78 = arith.constant dense<0.000000e+00> : vector<5xf32>
    %157 = vector.multi_reduction <add>, %156, %cst_78 [1] : vector<5x32xf32> to vector<5xf32>
    %158 = vector.shape_cast %157 : vector<5xf32> to vector<5x1xf32>
    %cst_79 = arith.constant 3.200000e+01 : f32
    %159 = vector.broadcast %cst_79 : f32 to vector<5x1xf32>
    %160 = arith.divf %158, %159 : vector<5x1xf32>
    %cst_80 = arith.constant 9.99999974E-6 : f32
    %161 = vector.broadcast %cst_80 : f32 to vector<5x1xf32>
    %162 = arith.addf %160, %161 : vector<5x1xf32>
    %163 = math.rsqrt %162 : vector<5x1xf32>
    %164 = vector.broadcast %163 : vector<5x1xf32> to vector<5x32xf32>
    %165 = arith.mulf %155, %164 : vector<5x32xf32>
    %166 = vector.broadcast %147 : vector<1x32xf32> to vector<5x32xf32>
    %167 = arith.mulf %165, %166 : vector<5x32xf32>
    %168 = vector.broadcast %149 : vector<1x32xf32> to vector<5x32xf32>
    %169 = arith.addf %167, %168 : vector<5x32xf32>
    %c0_81 = arith.constant 0 : index
    %c0_82 = arith.constant 0 : index
    %c0_83 = arith.constant 0 : index
    %170 = vector.load %arg14[%c0_81, %c0_82, %c0_83] : memref<2x32x64xf32, #tpu.memory_space<vmem>>, vector<1x32x64xf32>
    %171 = vector.shape_cast %170 : vector<1x32x64xf32> to vector<32x64xf32>
    %cst_84 = arith.constant dense<0.000000e+00> : vector<5x64xf32>
    %172 = tpu.matmul %169, %171, %cst_84 {dimension_numbers = #tpu.dot_dimension_numbers<[1], [0], [0], [1], [0, 0, 1, 1], [], []>} : vector<5x32xf32>, vector<32x64xf32>, vector<5x64xf32> -> vector<5x64xf32>
    %c0_85 = arith.constant 0 : index
    %c0_86 = arith.constant 0 : index
    %c0_87 = arith.constant 0 : index
    %173 = vector.load %arg15[%c0_85, %c0_86, %c0_87] : memref<2x1x64xf32, #tpu.memory_space<vmem>>, vector<1x1x64xf32>
    %174 = vector.shape_cast %173 : vector<1x1x64xf32> to vector<1x64xf32>
    %175 = vector.broadcast %174 : vector<1x64xf32> to vector<5x64xf32>
    %176 = arith.addf %172, %175 : vector<5x64xf32>
    %cst_88 = arith.constant 5.000000e-01 : f32
    %177 = vector.broadcast %cst_88 : f32 to vector<5x64xf32>
    %178 = arith.mulf %177, %176 : vector<5x64xf32>
    %cst_89 = arith.constant 0.707106769 : f32
    %179 = vector.broadcast %cst_89 : f32 to vector<5x64xf32>
    %180 = arith.mulf %176, %179 : vector<5x64xf32>
    %cst_90 = arith.constant 0.000000e+00 : f32
    %181 = vector.broadcast %cst_90 : f32 to vector<5x64xf32>
    %182 = arith.cmpf olt, %180, %181 : vector<5x64xf32>
    %cst_91 = arith.constant -1.000000e+00 : f32
    %cst_92 = arith.constant 1.000000e+00 : f32
    %183 = vector.broadcast %cst_91 : f32 to vector<5x64xf32>
    %184 = vector.broadcast %cst_92 : f32 to vector<5x64xf32>
    %185 = arith.select %182, %183, %184 : vector<5x64xi1>, vector<5x64xf32>
    %186 = math.absf %180 : vector<5x64xf32>
    %cst_93 = arith.constant 0.327591091 : f32
    %187 = vector.broadcast %cst_93 : f32 to vector<5x64xf32>
    %188 = arith.mulf %187, %186 : vector<5x64xf32>
    %cst_94 = arith.constant 1.000000e+00 : f32
    %189 = vector.broadcast %cst_94 : f32 to vector<5x64xf32>
    %190 = arith.addf %189, %188 : vector<5x64xf32>
    %cst_95 = arith.constant 1.000000e+00 : f32
    %191 = vector.broadcast %cst_95 : f32 to vector<5x64xf32>
    %192 = arith.divf %191, %190 : vector<5x64xf32>
    %cst_96 = arith.constant 1.06140542 : f32
    %193 = vector.broadcast %cst_96 : f32 to vector<5x64xf32>
    %194 = arith.mulf %193, %192 : vector<5x64xf32>
    %cst_97 = arith.constant -1.45315206 : f32
    %195 = vector.broadcast %cst_97 : f32 to vector<5x64xf32>
    %196 = arith.addf %194, %195 : vector<5x64xf32>
    %197 = arith.mulf %196, %192 : vector<5x64xf32>
    %cst_98 = arith.constant 1.42141378 : f32
    %198 = vector.broadcast %cst_98 : f32 to vector<5x64xf32>
    %199 = arith.addf %197, %198 : vector<5x64xf32>
    %200 = arith.mulf %199, %192 : vector<5x64xf32>
    %cst_99 = arith.constant -0.284496725 : f32
    %201 = vector.broadcast %cst_99 : f32 to vector<5x64xf32>
    %202 = arith.addf %200, %201 : vector<5x64xf32>
    %203 = arith.mulf %202, %192 : vector<5x64xf32>
    %cst_100 = arith.constant 0.254829586 : f32
    %204 = vector.broadcast %cst_100 : f32 to vector<5x64xf32>
    %205 = arith.addf %203, %204 : vector<5x64xf32>
    %206 = arith.mulf %205, %192 : vector<5x64xf32>
    %cst_101 = arith.constant 0.000000e+00 : f32
    %207 = vector.broadcast %cst_101 : f32 to vector<5x64xf32>
    %208 = arith.subf %207, %186 : vector<5x64xf32>
    %209 = arith.mulf %208, %186 : vector<5x64xf32>
    %210 = math.exp %209 : vector<5x64xf32>
    %211 = arith.mulf %206, %210 : vector<5x64xf32>
    %cst_102 = arith.constant 1.000000e+00 : f32
    %212 = vector.broadcast %cst_102 : f32 to vector<5x64xf32>
    %213 = arith.subf %212, %211 : vector<5x64xf32>
    %214 = arith.mulf %185, %213 : vector<5x64xf32>
    %cst_103 = arith.constant 1.000000e+00 : f32
    %215 = vector.broadcast %cst_103 : f32 to vector<5x64xf32>
    %216 = arith.addf %215, %214 : vector<5x64xf32>
    %217 = arith.mulf %178, %216 : vector<5x64xf32>
    %c0_104 = arith.constant 0 : index
    %c0_105 = arith.constant 0 : index
    %c0_106 = arith.constant 0 : index
    %218 = vector.load %arg16[%c0_104, %c0_105, %c0_106] : memref<2x64x32xf32, #tpu.memory_space<vmem>>, vector<1x64x32xf32>
    %219 = vector.shape_cast %218 : vector<1x64x32xf32> to vector<64x32xf32>
    %cst_107 = arith.constant dense<0.000000e+00> : vector<5x32xf32>
    %220 = tpu.matmul %217, %219, %cst_107 {dimension_numbers = #tpu.dot_dimension_numbers<[1], [0], [0], [1], [0, 0, 1, 1], [], []>} : vector<5x64xf32>, vector<64x32xf32>, vector<5x32xf32> -> vector<5x32xf32>
    %221 = arith.addf %145, %220 : vector<5x32xf32>
    %c0_108 = arith.constant 0 : index
    %c0_109 = arith.constant 0 : index
    %c0_110 = arith.constant 0 : index
    %222 = vector.load %arg17[%c0_108, %c0_109, %c0_110] : memref<2x1x32xf32, #tpu.memory_space<vmem>>, vector<1x1x32xf32>
    %223 = vector.shape_cast %222 : vector<1x1x32xf32> to vector<1x32xf32>
    %224 = vector.broadcast %223 : vector<1x32xf32> to vector<5x32xf32>
    %225 = arith.addf %221, %224 : vector<5x32xf32>
    %c1 = arith.constant 1 : index
    %c0_111 = arith.constant 0 : index
    %c0_112 = arith.constant 0 : index
    %226 = vector.load %arg5[%c1, %c0_111, %c0_112] : memref<2x1x32xf32, #tpu.memory_space<vmem>>, vector<1x1x32xf32>
    %227 = vector.shape_cast %226 : vector<1x1x32xf32> to vector<1x32xf32>
    %c1_113 = arith.constant 1 : index
    %c0_114 = arith.constant 0 : index
    %c0_115 = arith.constant 0 : index
    %228 = vector.load %arg6[%c1_113, %c0_114, %c0_115] : memref<2x1x32xf32, #tpu.memory_space<vmem>>, vector<1x1x32xf32>
    %229 = vector.shape_cast %228 : vector<1x1x32xf32> to vector<1x32xf32>
    %cst_116 = arith.constant dense<0.000000e+00> : vector<5xf32>
    %230 = vector.multi_reduction <add>, %225, %cst_116 [1] : vector<5x32xf32> to vector<5xf32>
    %231 = vector.shape_cast %230 : vector<5xf32> to vector<5x1xf32>
    %cst_117 = arith.constant 3.200000e+01 : f32
    %232 = vector.broadcast %cst_117 : f32 to vector<5x1xf32>
    %233 = arith.divf %231, %232 : vector<5x1xf32>
    %234 = vector.broadcast %233 : vector<5x1xf32> to vector<5x32xf32>
    %235 = arith.subf %225, %234 : vector<5x32xf32>
    %236 = arith.mulf %235, %235 : vector<5x32xf32>
    %cst_118 = arith.constant dense<0.000000e+00> : vector<5xf32>
    %237 = vector.multi_reduction <add>, %236, %cst_118 [1] : vector<5x32xf32> to vector<5xf32>
    %238 = vector.shape_cast %237 : vector<5xf32> to vector<5x1xf32>
    %cst_119 = arith.constant 3.200000e+01 : f32
    %239 = vector.broadcast %cst_119 : f32 to vector<5x1xf32>
    %240 = arith.divf %238, %239 : vector<5x1xf32>
    %cst_120 = arith.constant 9.99999974E-6 : f32
    %241 = vector.broadcast %cst_120 : f32 to vector<5x1xf32>
    %242 = arith.addf %240, %241 : vector<5x1xf32>
    %243 = math.rsqrt %242 : vector<5x1xf32>
    %244 = vector.broadcast %243 : vector<5x1xf32> to vector<5x32xf32>
    %245 = arith.mulf %235, %244 : vector<5x32xf32>
    %246 = vector.broadcast %227 : vector<1x32xf32> to vector<5x32xf32>
    %247 = arith.mulf %245, %246 : vector<5x32xf32>
    %248 = vector.broadcast %229 : vector<1x32xf32> to vector<5x32xf32>
    %249 = arith.addf %247, %248 : vector<5x32xf32>
    %c1_121 = arith.constant 1 : index
    %c0_122 = arith.constant 0 : index
    %c0_123 = arith.constant 0 : index
    %250 = vector.load %arg7[%c1_121, %c0_122, %c0_123] : memref<2x32x64xf32, #tpu.memory_space<vmem>>, vector<1x32x64xf32>
    %251 = vector.shape_cast %250 : vector<1x32x64xf32> to vector<32x64xf32>
    %cst_124 = arith.constant dense<0.000000e+00> : vector<5x64xf32>
    %252 = tpu.matmul %249, %251, %cst_124 {dimension_numbers = #tpu.dot_dimension_numbers<[1], [0], [0], [1], [0, 0, 1, 1], [], []>} : vector<5x32xf32>, vector<32x64xf32>, vector<5x64xf32> -> vector<5x64xf32>
    %cst_125 = arith.constant 2.500000e-01 : f32
    %253 = vector.broadcast %cst_125 : f32 to vector<5x64xf32>
    %254 = arith.mulf %252, %253 : vector<5x64xf32>
    %c1_126 = arith.constant 1 : index
    %c0_127 = arith.constant 0 : index
    %c0_128 = arith.constant 0 : index
    %255 = vector.load %arg8[%c1_126, %c0_127, %c0_128] : memref<2x32x64xf32, #tpu.memory_space<vmem>>, vector<1x32x64xf32>
    %256 = vector.shape_cast %255 : vector<1x32x64xf32> to vector<32x64xf32>
    %cst_129 = arith.constant dense<0.000000e+00> : vector<5x64xf32>
    %257 = tpu.matmul %249, %256, %cst_129 {dimension_numbers = #tpu.dot_dimension_numbers<[1], [0], [0], [1], [0, 0, 1, 1], [], []>} : vector<5x32xf32>, vector<32x64xf32>, vector<5x64xf32> -> vector<5x64xf32>
    %c1_130 = arith.constant 1 : index
    %c0_131 = arith.constant 0 : index
    %c0_132 = arith.constant 0 : index
    %258 = vector.load %arg9[%c1_130, %c0_131, %c0_132] : memref<2x32x64xf32, #tpu.memory_space<vmem>>, vector<1x32x64xf32>
    %259 = vector.shape_cast %258 : vector<1x32x64xf32> to vector<32x64xf32>
    %cst_133 = arith.constant dense<0.000000e+00> : vector<5x64xf32>
    %260 = tpu.matmul %249, %259, %cst_133 {dimension_numbers = #tpu.dot_dimension_numbers<[1], [0], [0], [1], [0, 0, 1, 1], [], []>} : vector<5x32xf32>, vector<32x64xf32>, vector<5x64xf32> -> vector<5x64xf32>
    %cst_134 = arith.constant 0.000000e+00 : f32
    %261 = vector.broadcast %cst_134 : f32 to vector<5x64xf32>
    %cst_135 = arith.constant 0.000000e+00 : f32
    %262 = vector.broadcast %cst_135 : f32 to vector<5x64xf32>
    %263 = arith.select %22, %254, %262 : vector<5x64xi1>, vector<5x64xf32>
    %cst_136 = arith.constant dense<0.000000e+00> : vector<5x5xf32>
    %264 = tpu.matmul %263, %257, %cst_136 {dimension_numbers = #tpu.dot_dimension_numbers<[1], [1], [0], [0], [0, 0, 1, 0], [], []>} : vector<5x64xf32>, vector<5x64xf32>, vector<5x5xf32> -> vector<5x5xf32>
    %cst_137 = arith.constant dense<0xFF800000> : vector<5xf32>
    %265 = vector.multi_reduction <maximumf>, %264, %cst_137 [1] : vector<5x5xf32> to vector<5xf32>
    %266 = vector.shape_cast %265 : vector<5xf32> to vector<5x1xf32>
    %267 = vector.broadcast %266 : vector<5x1xf32> to vector<5x5xf32>
    %268 = arith.subf %264, %267 : vector<5x5xf32>
    %269 = math.exp %268 : vector<5x5xf32>
    %cst_138 = arith.constant dense<0.000000e+00> : vector<5xf32>
    %270 = vector.multi_reduction <add>, %269, %cst_138 [1] : vector<5x5xf32> to vector<5xf32>
    %271 = vector.shape_cast %270 : vector<5xf32> to vector<5x1xf32>
    %272 = vector.broadcast %271 : vector<5x1xf32> to vector<5x5xf32>
    %273 = arith.divf %269, %272 : vector<5x5xf32>
    %cst_139 = arith.constant 0.000000e+00 : f32
    %274 = vector.broadcast %cst_139 : f32 to vector<5x64xf32>
    %275 = arith.select %22, %260, %274 : vector<5x64xi1>, vector<5x64xf32>
    %cst_140 = arith.constant dense<0.000000e+00> : vector<5x64xf32>
    %276 = tpu.matmul %273, %275, %cst_140 {dimension_numbers = #tpu.dot_dimension_numbers<[1], [0], [0], [1], [0, 0, 1, 1], [], []>} : vector<5x5xf32>, vector<5x64xf32>, vector<5x64xf32> -> vector<5x64xf32>
    %277 = arith.addf %261, %276 : vector<5x64xf32>
    %cst_141 = arith.constant 0.000000e+00 : f32
    %278 = vector.broadcast %cst_141 : f32 to vector<5x64xf32>
    %279 = arith.select %27, %254, %278 : vector<5x64xi1>, vector<5x64xf32>
    %cst_142 = arith.constant dense<0.000000e+00> : vector<5x5xf32>
    %280 = tpu.matmul %279, %257, %cst_142 {dimension_numbers = #tpu.dot_dimension_numbers<[1], [1], [0], [0], [0, 0, 1, 0], [], []>} : vector<5x64xf32>, vector<5x64xf32>, vector<5x5xf32> -> vector<5x5xf32>
    %cst_143 = arith.constant dense<0xFF800000> : vector<5xf32>
    %281 = vector.multi_reduction <maximumf>, %280, %cst_143 [1] : vector<5x5xf32> to vector<5xf32>
    %282 = vector.shape_cast %281 : vector<5xf32> to vector<5x1xf32>
    %283 = vector.broadcast %282 : vector<5x1xf32> to vector<5x5xf32>
    %284 = arith.subf %280, %283 : vector<5x5xf32>
    %285 = math.exp %284 : vector<5x5xf32>
    %cst_144 = arith.constant dense<0.000000e+00> : vector<5xf32>
    %286 = vector.multi_reduction <add>, %285, %cst_144 [1] : vector<5x5xf32> to vector<5xf32>
    %287 = vector.shape_cast %286 : vector<5xf32> to vector<5x1xf32>
    %288 = vector.broadcast %287 : vector<5x1xf32> to vector<5x5xf32>
    %289 = arith.divf %285, %288 : vector<5x5xf32>
    %cst_145 = arith.constant 0.000000e+00 : f32
    %290 = vector.broadcast %cst_145 : f32 to vector<5x64xf32>
    %291 = arith.select %27, %260, %290 : vector<5x64xi1>, vector<5x64xf32>
    %cst_146 = arith.constant dense<0.000000e+00> : vector<5x64xf32>
    %292 = tpu.matmul %289, %291, %cst_146 {dimension_numbers = #tpu.dot_dimension_numbers<[1], [0], [0], [1], [0, 0, 1, 1], [], []>} : vector<5x5xf32>, vector<5x64xf32>, vector<5x64xf32> -> vector<5x64xf32>
    %293 = arith.addf %277, %292 : vector<5x64xf32>
    %cst_147 = arith.constant 0.000000e+00 : f32
    %294 = vector.broadcast %cst_147 : f32 to vector<5x64xf32>
    %295 = arith.select %32, %254, %294 : vector<5x64xi1>, vector<5x64xf32>
    %cst_148 = arith.constant dense<0.000000e+00> : vector<5x5xf32>
    %296 = tpu.matmul %295, %257, %cst_148 {dimension_numbers = #tpu.dot_dimension_numbers<[1], [1], [0], [0], [0, 0, 1, 0], [], []>} : vector<5x64xf32>, vector<5x64xf32>, vector<5x5xf32> -> vector<5x5xf32>
    %cst_149 = arith.constant dense<0xFF800000> : vector<5xf32>
    %297 = vector.multi_reduction <maximumf>, %296, %cst_149 [1] : vector<5x5xf32> to vector<5xf32>
    %298 = vector.shape_cast %297 : vector<5xf32> to vector<5x1xf32>
    %299 = vector.broadcast %298 : vector<5x1xf32> to vector<5x5xf32>
    %300 = arith.subf %296, %299 : vector<5x5xf32>
    %301 = math.exp %300 : vector<5x5xf32>
    %cst_150 = arith.constant dense<0.000000e+00> : vector<5xf32>
    %302 = vector.multi_reduction <add>, %301, %cst_150 [1] : vector<5x5xf32> to vector<5xf32>
    %303 = vector.shape_cast %302 : vector<5xf32> to vector<5x1xf32>
    %304 = vector.broadcast %303 : vector<5x1xf32> to vector<5x5xf32>
    %305 = arith.divf %301, %304 : vector<5x5xf32>
    %cst_151 = arith.constant 0.000000e+00 : f32
    %306 = vector.broadcast %cst_151 : f32 to vector<5x64xf32>
    %307 = arith.select %32, %260, %306 : vector<5x64xi1>, vector<5x64xf32>
    %cst_152 = arith.constant dense<0.000000e+00> : vector<5x64xf32>
    %308 = tpu.matmul %305, %307, %cst_152 {dimension_numbers = #tpu.dot_dimension_numbers<[1], [0], [0], [1], [0, 0, 1, 1], [], []>} : vector<5x5xf32>, vector<5x64xf32>, vector<5x64xf32> -> vector<5x64xf32>
    %309 = arith.addf %293, %308 : vector<5x64xf32>
    %cst_153 = arith.constant 0.000000e+00 : f32
    %310 = vector.broadcast %cst_153 : f32 to vector<5x64xf32>
    %311 = arith.select %37, %254, %310 : vector<5x64xi1>, vector<5x64xf32>
    %cst_154 = arith.constant dense<0.000000e+00> : vector<5x5xf32>
    %312 = tpu.matmul %311, %257, %cst_154 {dimension_numbers = #tpu.dot_dimension_numbers<[1], [1], [0], [0], [0, 0, 1, 0], [], []>} : vector<5x64xf32>, vector<5x64xf32>, vector<5x5xf32> -> vector<5x5xf32>
    %cst_155 = arith.constant dense<0xFF800000> : vector<5xf32>
    %313 = vector.multi_reduction <maximumf>, %312, %cst_155 [1] : vector<5x5xf32> to vector<5xf32>
    %314 = vector.shape_cast %313 : vector<5xf32> to vector<5x1xf32>
    %315 = vector.broadcast %314 : vector<5x1xf32> to vector<5x5xf32>
    %316 = arith.subf %312, %315 : vector<5x5xf32>
    %317 = math.exp %316 : vector<5x5xf32>
    %cst_156 = arith.constant dense<0.000000e+00> : vector<5xf32>
    %318 = vector.multi_reduction <add>, %317, %cst_156 [1] : vector<5x5xf32> to vector<5xf32>
    %319 = vector.shape_cast %318 : vector<5xf32> to vector<5x1xf32>
    %320 = vector.broadcast %319 : vector<5x1xf32> to vector<5x5xf32>
    %321 = arith.divf %317, %320 : vector<5x5xf32>
    %cst_157 = arith.constant 0.000000e+00 : f32
    %322 = vector.broadcast %cst_157 : f32 to vector<5x64xf32>
    %323 = arith.select %37, %260, %322 : vector<5x64xi1>, vector<5x64xf32>
    %cst_158 = arith.constant dense<0.000000e+00> : vector<5x64xf32>
    %324 = tpu.matmul %321, %323, %cst_158 {dimension_numbers = #tpu.dot_dimension_numbers<[1], [0], [0], [1], [0, 0, 1, 1], [], []>} : vector<5x5xf32>, vector<5x64xf32>, vector<5x64xf32> -> vector<5x64xf32>
    %325 = arith.addf %309, %324 : vector<5x64xf32>
    %c1_159 = arith.constant 1 : index
    %c0_160 = arith.constant 0 : index
    %c0_161 = arith.constant 0 : index
    %326 = vector.load %arg10[%c1_159, %c0_160, %c0_161] : memref<2x64x32xf32, #tpu.memory_space<vmem>>, vector<1x64x32xf32>
    %327 = vector.shape_cast %326 : vector<1x64x32xf32> to vector<64x32xf32>
    %cst_162 = arith.constant dense<0.000000e+00> : vector<5x32xf32>
    %328 = tpu.matmul %325, %327, %cst_162 {dimension_numbers = #tpu.dot_dimension_numbers<[1], [0], [0], [1], [0, 0, 1, 1], [], []>} : vector<5x64xf32>, vector<64x32xf32>, vector<5x32xf32> -> vector<5x32xf32>
    %329 = arith.addf %225, %328 : vector<5x32xf32>
    %c1_163 = arith.constant 1 : index
    %c0_164 = arith.constant 0 : index
    %c0_165 = arith.constant 0 : index
    %330 = vector.load %arg11[%c1_163, %c0_164, %c0_165] : memref<2x1x32xf32, #tpu.memory_space<vmem>>, vector<1x1x32xf32>
    %331 = vector.shape_cast %330 : vector<1x1x32xf32> to vector<1x32xf32>
    %332 = vector.broadcast %331 : vector<1x32xf32> to vector<5x32xf32>
    %333 = arith.addf %329, %332 : vector<5x32xf32>
    %c1_166 = arith.constant 1 : index
    %c0_167 = arith.constant 0 : index
    %c0_168 = arith.constant 0 : index
    %334 = vector.load %arg12[%c1_166, %c0_167, %c0_168] : memref<2x1x32xf32, #tpu.memory_space<vmem>>, vector<1x1x32xf32>
    %335 = vector.shape_cast %334 : vector<1x1x32xf32> to vector<1x32xf32>
    %c1_169 = arith.constant 1 : index
    %c0_170 = arith.constant 0 : index
    %c0_171 = arith.constant 0 : index
    %336 = vector.load %arg13[%c1_169, %c0_170, %c0_171] : memref<2x1x32xf32, #tpu.memory_space<vmem>>, vector<1x1x32xf32>
    %337 = vector.shape_cast %336 : vector<1x1x32xf32> to vector<1x32xf32>
    %cst_172 = arith.constant dense<0.000000e+00> : vector<5xf32>
    %338 = vector.multi_reduction <add>, %333, %cst_172 [1] : vector<5x32xf32> to vector<5xf32>
    %339 = vector.shape_cast %338 : vector<5xf32> to vector<5x1xf32>
    %cst_173 = arith.constant 3.200000e+01 : f32
    %340 = vector.broadcast %cst_173 : f32 to vector<5x1xf32>
    %341 = arith.divf %339, %340 : vector<5x1xf32>
    %342 = vector.broadcast %341 : vector<5x1xf32> to vector<5x32xf32>
    %343 = arith.subf %333, %342 : vector<5x32xf32>
    %344 = arith.mulf %343, %343 : vector<5x32xf32>
    %cst_174 = arith.constant dense<0.000000e+00> : vector<5xf32>
    %345 = vector.multi_reduction <add>, %344, %cst_174 [1] : vector<5x32xf32> to vector<5xf32>
    %346 = vector.shape_cast %345 : vector<5xf32> to vector<5x1xf32>
    %cst_175 = arith.constant 3.200000e+01 : f32
    %347 = vector.broadcast %cst_175 : f32 to vector<5x1xf32>
    %348 = arith.divf %346, %347 : vector<5x1xf32>
    %cst_176 = arith.constant 9.99999974E-6 : f32
    %349 = vector.broadcast %cst_176 : f32 to vector<5x1xf32>
    %350 = arith.addf %348, %349 : vector<5x1xf32>
    %351 = math.rsqrt %350 : vector<5x1xf32>
    %352 = vector.broadcast %351 : vector<5x1xf32> to vector<5x32xf32>
    %353 = arith.mulf %343, %352 : vector<5x32xf32>
    %354 = vector.broadcast %335 : vector<1x32xf32> to vector<5x32xf32>
    %355 = arith.mulf %353, %354 : vector<5x32xf32>
    %356 = vector.broadcast %337 : vector<1x32xf32> to vector<5x32xf32>
    %357 = arith.addf %355, %356 : vector<5x32xf32>
    %c1_177 = arith.constant 1 : index
    %c0_178 = arith.constant 0 : index
    %c0_179 = arith.constant 0 : index
    %358 = vector.load %arg14[%c1_177, %c0_178, %c0_179] : memref<2x32x64xf32, #tpu.memory_space<vmem>>, vector<1x32x64xf32>
    %359 = vector.shape_cast %358 : vector<1x32x64xf32> to vector<32x64xf32>
    %cst_180 = arith.constant dense<0.000000e+00> : vector<5x64xf32>
    %360 = tpu.matmul %357, %359, %cst_180 {dimension_numbers = #tpu.dot_dimension_numbers<[1], [0], [0], [1], [0, 0, 1, 1], [], []>} : vector<5x32xf32>, vector<32x64xf32>, vector<5x64xf32> -> vector<5x64xf32>
    %c1_181 = arith.constant 1 : index
    %c0_182 = arith.constant 0 : index
    %c0_183 = arith.constant 0 : index
    %361 = vector.load %arg15[%c1_181, %c0_182, %c0_183] : memref<2x1x64xf32, #tpu.memory_space<vmem>>, vector<1x1x64xf32>
    %362 = vector.shape_cast %361 : vector<1x1x64xf32> to vector<1x64xf32>
    %363 = vector.broadcast %362 : vector<1x64xf32> to vector<5x64xf32>
    %364 = arith.addf %360, %363 : vector<5x64xf32>
    %cst_184 = arith.constant 5.000000e-01 : f32
    %365 = vector.broadcast %cst_184 : f32 to vector<5x64xf32>
    %366 = arith.mulf %365, %364 : vector<5x64xf32>
    %cst_185 = arith.constant 0.707106769 : f32
    %367 = vector.broadcast %cst_185 : f32 to vector<5x64xf32>
    %368 = arith.mulf %364, %367 : vector<5x64xf32>
    %cst_186 = arith.constant 0.000000e+00 : f32
    %369 = vector.broadcast %cst_186 : f32 to vector<5x64xf32>
    %370 = arith.cmpf olt, %368, %369 : vector<5x64xf32>
    %cst_187 = arith.constant -1.000000e+00 : f32
    %cst_188 = arith.constant 1.000000e+00 : f32
    %371 = vector.broadcast %cst_187 : f32 to vector<5x64xf32>
    %372 = vector.broadcast %cst_188 : f32 to vector<5x64xf32>
    %373 = arith.select %370, %371, %372 : vector<5x64xi1>, vector<5x64xf32>
    %374 = math.absf %368 : vector<5x64xf32>
    %cst_189 = arith.constant 0.327591091 : f32
    %375 = vector.broadcast %cst_189 : f32 to vector<5x64xf32>
    %376 = arith.mulf %375, %374 : vector<5x64xf32>
    %cst_190 = arith.constant 1.000000e+00 : f32
    %377 = vector.broadcast %cst_190 : f32 to vector<5x64xf32>
    %378 = arith.addf %377, %376 : vector<5x64xf32>
    %cst_191 = arith.constant 1.000000e+00 : f32
    %379 = vector.broadcast %cst_191 : f32 to vector<5x64xf32>
    %380 = arith.divf %379, %378 : vector<5x64xf32>
    %cst_192 = arith.constant 1.06140542 : f32
    %381 = vector.broadcast %cst_192 : f32 to vector<5x64xf32>
    %382 = arith.mulf %381, %380 : vector<5x64xf32>
    %cst_193 = arith.constant -1.45315206 : f32
    %383 = vector.broadcast %cst_193 : f32 to vector<5x64xf32>
    %384 = arith.addf %382, %383 : vector<5x64xf32>
    %385 = arith.mulf %384, %380 : vector<5x64xf32>
    %cst_194 = arith.constant 1.42141378 : f32
    %386 = vector.broadcast %cst_194 : f32 to vector<5x64xf32>
    %387 = arith.addf %385, %386 : vector<5x64xf32>
    %388 = arith.mulf %387, %380 : vector<5x64xf32>
    %cst_195 = arith.constant -0.284496725 : f32
    %389 = vector.broadcast %cst_195 : f32 to vector<5x64xf32>
    %390 = arith.addf %388, %389 : vector<5x64xf32>
    %391 = arith.mulf %390, %380 : vector<5x64xf32>
    %cst_196 = arith.constant 0.254829586 : f32
    %392 = vector.broadcast %cst_196 : f32 to vector<5x64xf32>
    %393 = arith.addf %391, %392 : vector<5x64xf32>
    %394 = arith.mulf %393, %380 : vector<5x64xf32>
    %cst_197 = arith.constant 0.000000e+00 : f32
    %395 = vector.broadcast %cst_197 : f32 to vector<5x64xf32>
    %396 = arith.subf %395, %374 : vector<5x64xf32>
    %397 = arith.mulf %396, %374 : vector<5x64xf32>
    %398 = math.exp %397 : vector<5x64xf32>
    %399 = arith.mulf %394, %398 : vector<5x64xf32>
    %cst_198 = arith.constant 1.000000e+00 : f32
    %400 = vector.broadcast %cst_198 : f32 to vector<5x64xf32>
    %401 = arith.subf %400, %399 : vector<5x64xf32>
    %402 = arith.mulf %373, %401 : vector<5x64xf32>
    %cst_199 = arith.constant 1.000000e+00 : f32
    %403 = vector.broadcast %cst_199 : f32 to vector<5x64xf32>
    %404 = arith.addf %403, %402 : vector<5x64xf32>
    %405 = arith.mulf %366, %404 : vector<5x64xf32>
    %c1_200 = arith.constant 1 : index
    %c0_201 = arith.constant 0 : index
    %c0_202 = arith.constant 0 : index
    %406 = vector.load %arg16[%c1_200, %c0_201, %c0_202] : memref<2x64x32xf32, #tpu.memory_space<vmem>>, vector<1x64x32xf32>
    %407 = vector.shape_cast %406 : vector<1x64x32xf32> to vector<64x32xf32>
    %cst_203 = arith.constant dense<0.000000e+00> : vector<5x32xf32>
    %408 = tpu.matmul %405, %407, %cst_203 {dimension_numbers = #tpu.dot_dimension_numbers<[1], [0], [0], [1], [0, 0, 1, 1], [], []>} : vector<5x64xf32>, vector<64x32xf32>, vector<5x32xf32> -> vector<5x32xf32>
    %409 = arith.addf %333, %408 : vector<5x32xf32>
    %c1_204 = arith.constant 1 : index
    %c0_205 = arith.constant 0 : index
    %c0_206 = arith.constant 0 : index
    %410 = vector.load %arg17[%c1_204, %c0_205, %c0_206] : memref<2x1x32xf32, #tpu.memory_space<vmem>>, vector<1x1x32xf32>
    %411 = vector.shape_cast %410 : vector<1x1x32xf32> to vector<1x32xf32>
    %412 = vector.broadcast %411 : vector<1x32xf32> to vector<5x32xf32>
    %413 = arith.addf %409, %412 : vector<5x32xf32>
    %414 = vector.extract_strided_slice %413 {offsets = [0, 0], sizes = [1, 32], strides = [1, 1]} : vector<5x32xf32> to vector<1x32xf32>
    %c0_207 = arith.constant 0 : index
    %c0_208 = arith.constant 0 : index
    %c0_209 = arith.constant 0 : index
    %415 = vector.load %arg18[%c0_207, %c0_208, %c0_209] : memref<1x1x32xf32, #tpu.memory_space<vmem>>, vector<1x1x32xf32>
    %416 = vector.shape_cast %415 : vector<1x1x32xf32> to vector<1x32xf32>
    %417 = vector.shape_cast %414 : vector<1x32xf32> to vector<1x1x32xf32>
    tpu.vector_store %arg18[%c0_207, %c0_208, %c0_209], %417 {strides = array<i32>} : memref<1x1x32xf32, #tpu.memory_space<vmem>>, vector<1x1x32xf32>,
    return
  }
  func.func @transform_0(%arg0: i32) -> (i32, i32, i32) {
    %c0_i32 = arith.constant 0 : i32
    %c0_i32_0 = arith.constant 0 : i32
    %c0_i32_1 = arith.constant 0 : i32
    return %arg0, %c0_i32, %c0_i32_0 : i32, i32, i32
  }
  func.func @transform_1(%arg0: i32) -> (i32, i32) {
    %c0_i32 = arith.constant 0 : i32
    %c0_i32_0 = arith.constant 0 : i32
    %c0_i32_1 = arith.constant 0 : i32
    return %c0_i32, %c0_i32_0 : i32, i32
  }
  func.func @transform_2(%arg0: i32) -> (i32, i32) {
    %c0_i32 = arith.constant 0 : i32
    %c0_i32_0 = arith.constant 0 : i32
    %c0_i32_1 = arith.constant 0 : i32
    return %c0_i32, %c0_i32_0 : i32, i32
  }
  func.func @transform_3(%arg0: i32) -> (i32, i32, i32) {
    %c0_i32 = arith.constant 0 : i32
    %c0_i32_0 = arith.constant 0 : i32
    %c0_i32_1 = arith.constant 0 : i32
    %c0_i32_2 = arith.constant 0 : i32
    return %c0_i32, %c0_i32_0, %c0_i32_1 : i32, i32, i32
  }
  func.func @transform_4(%arg0: i32) -> (i32, i32, i32) {
    %c0_i32 = arith.constant 0 : i32
    %c0_i32_0 = arith.constant 0 : i32
    %c0_i32_1 = arith.constant 0 : i32
    %c0_i32_2 = arith.constant 0 : i32
    return %c0_i32, %c0_i32_0, %c0_i32_1 : i32, i32, i32
  }
  func.func @transform_5(%arg0: i32) -> (i32, i32, i32) {
    %c0_i32 = arith.constant 0 : i32
    %c0_i32_0 = arith.constant 0 : i32
    %c0_i32_1 = arith.constant 0 : i32
    %c0_i32_2 = arith.constant 0 : i32
    return %c0_i32, %c0_i32_0, %c0_i32_1 : i32, i32, i32
  }
  func.func @transform_6(%arg0: i32) -> (i32, i32, i32) {
    %c0_i32 = arith.constant 0 : i32
    %c0_i32_0 = arith.constant 0 : i32
    %c0_i32_1 = arith.constant 0 : i32
    %c0_i32_2 = arith.constant 0 : i32
    return %c0_i32, %c0_i32_0, %c0_i32_1 : i32, i32, i32
  }
  func.func @transform_7(%arg0: i32) -> (i32, i32, i32) {
    %c0_i32 = arith.constant 0 : i32
    %c0_i32_0 = arith.constant 0 : i32
    %c0_i32_1 = arith.constant 0 : i32
    %c0_i32_2 = arith.constant 0 : i32
    return %c0_i32, %c0_i32_0, %c0_i32_1 : i32, i32, i32
  }
  func.func @transform_8(%arg0: i32) -> (i32, i32, i32) {
    %c0_i32 = arith.constant 0 : i32
    %c0_i32_0 = arith.constant 0 : i32
    %c0_i32_1 = arith.constant 0 : i32
    %c0_i32_2 = arith.constant 0 : i32
    return %c0_i32, %c0_i32_0, %c0_i32_1 : i32, i32, i32
  }
  func.func @transform_9(%arg0: i32) -> (i32, i32, i32) {
    %c0_i32 = arith.constant 0 : i32
    %c0_i32_0 = arith.constant 0 : i32
    %c0_i32_1 = arith.constant 0 : i32
    %c0_i32_2 = arith.constant 0 : i32
    return %c0_i32, %c0_i32_0, %c0_i32_1 : i32, i32, i32
  }
  func.func @transform_10(%arg0: i32) -> (i32, i32, i32) {
    %c0_i32 = arith.constant 0 : i32
    %c0_i32_0 = arith.constant 0 : i32
    %c0_i32_1 = arith.constant 0 : i32
    %c0_i32_2 = arith.constant 0 : i32
    return %c0_i32, %c0_i32_0, %c0_i32_1 : i32, i32, i32
  }
  func.func @transform_11(%arg0: i32) -> (i32, i32, i32) {
    %c0_i32 = arith.constant 0 : i32
    %c0_i32_0 = arith.constant 0 : i32
    %c0_i32_1 = arith.constant 0 : i32
    %c0_i32_2 = arith.constant 0 : i32
    return %c0_i32, %c0_i32_0, %c0_i32_1 : i32, i32, i32
  }
  func.func @transform_12(%arg0: i32) -> (i32, i32, i32) {
    %c0_i32 = arith.constant 0 : i32
    %c0_i32_0 = arith.constant 0 : i32
    %c0_i32_1 = arith.constant 0 : i32
    %c0_i32_2 = arith.constant 0 : i32
    return %c0_i32, %c0_i32_0, %c0_i32_1 : i32, i32, i32
  }
  func.func @transform_13(%arg0: i32) -> (i32, i32, i32) {
    %c0_i32 = arith.constant 0 : i32
    %c0_i32_0 = arith.constant 0 : i32
    %c0_i32_1 = arith.constant 0 : i32
    %c0_i32_2 = arith.constant 0 : i32
    return %c0_i32, %c0_i32_0, %c0_i32_1 : i32, i32, i32
  }
  func.func @transform_14(%arg0: i32) -> (i32, i32, i32) {
    %c0_i32 = arith.constant 0 : i32
    %c0_i32_0 = arith.constant 0 : i32
    %c0_i32_1 = arith.constant 0 : i32
    %c0_i32_2 = arith.constant 0 : i32
    return %c0_i32, %c0_i32_0, %c0_i32_1 : i32, i32, i32
  }
  func.func @transform_15(%arg0: i32) -> (i32, i32, i32) {
    %c0_i32 = arith.constant 0 : i32
    %c0_i32_0 = arith.constant 0 : i32
    %c0_i32_1 = arith.constant 0 : i32
    %c0_i32_2 = arith.constant 0 : i32
    return %c0_i32, %c0_i32_0, %c0_i32_1 : i32, i32, i32
  }
  func.func @transform_16(%arg0: i32) -> (i32, i32, i32) {
    %c0_i32 = arith.constant 0 : i32
    %c0_i32_0 = arith.constant 0 : i32
    %c0_i32_1 = arith.constant 0 : i32
    %c0_i32_2 = arith.constant 0 : i32
    return %c0_i32, %c0_i32_0, %c0_i32_1 : i32, i32, i32
  }
  func.func @transform_17(%arg0: i32) -> (i32, i32, i32) {
    %c0_i32 = arith.constant 0 : i32
    %c0_i32_0 = arith.constant 0 : i32
    %c0_i32_1 = arith.constant 0 : i32
    return %arg0, %c0_i32, %c0_i32_0 : i32, i32, i32
  }
}

</mosaic_0001>

<bundles_post_ra>
// kernel: vit_forward.1
= control target key start
LH: loop header
LB: loop body
LE: loop exit
PB: predicated region body
PF: predicated region fallthrough
CT: control target
= control target key end

     0   :  { %s4594_s0 = inlined_call_operand.vmem [shape: f32[2,5,64], index: 0, kind: input, shape index: {}]   ;;  %s4595_s1 = inlined_call_operand.vmem [shape: f32[64,32], index: 1, kind: input, shape index: {}]   ;;  %s4596_s2 = inlined_call_operand.vmem [shape: f32[1,32], index: 2, kind: input, shape index: {}]   ;;  %s4597_s3 = inlined_call_operand.vmem [shape: f32[1,5,32], index: 3, kind: input, shape index: {}]   ;;  %s4598_s4 = inlined_call_operand.vmem [shape: f32[2,1,32], index: 4, kind: input, shape index: {}]   ;;  %s4599_s5 = inlined_call_operand.vmem [shape: f32[2,1,32], index: 5, kind: input, shape index: {}]   ;;  %s4600_s6 = inlined_call_operand.vmem [shape: f32[2,32,64], index: 6, kind: input, shape index: {}]   ;;  %s4601_s7 = inlined_call_operand.vmem [shape: f32[2,32,64], index: 7, kind: input, shape index: {}]   ;;  %s4602_s8 = inlined_call_operand.vmem [shape: f32[2,32,64], index: 8, kind: input, shape index: {}]   ;;  %s4603_s9 = inlined_call_operand.vmem [shape: f32[2,64,32], index: 9, kind: input, shape index: {}]   ;;  %s4604_s10 = inlined_call_operand.vmem [shape: f32[2,1,32], index: 10, kind: input, shape index: {}]   ;;  %s4605_s11 = inlined_call_operand.vmem [shape: f32[2,1,32], index: 11, kind: input, shape index: {}]   ;;  %s4606_s12 = inlined_call_operand.vmem [shape: f32[2,1,32], index: 12, kind: input, shape index: {}]   ;;  %s4607_s13 = inlined_call_operand.vmem [shape: f32[2,32,64], index: 13, kind: input, shape index: {}]   ;;  %s4608_s14 = inlined_call_operand.vmem [shape: f32[2,1,64], index: 14, kind: input, shape index: {}]   ;;  %s4609_s15 = inlined_call_operand.vmem [shape: f32[2,64,32], index: 15, kind: input, shape index: {}]   ;;  %s4610_s16 = inlined_call_operand.vmem [shape: f32[2,1,32], index: 16, kind: input, shape index: {}]   ;;  %s4611_s17 = inlined_call_operand.hbm [shape: f32[2,1,32], index: 17, kind: output, shape index: {}]  }
   0x1   :  { %4619 = sst [smem:[#allocation11_spill]] %s4594_s0 }
   0x2   :  { %4620 = sst [smem:[#allocation12_spill]] %s4595_s1 }
   0x3   :  { %4621 = sst [smem:[#allocation13_spill]] %s4596_s2 }
   0x4   :  { %22 = vsyncpa [#allocation3], 0 }
   0x5   :  { %24 = vsyncpa [#allocation3 + $0x1], 0  ;;  %s3933_s24 = smov 0   ;;  %s3935_s25 = smov 0  }
   0x6   :  { %s3937_s26 = smov 0   ;;  %s3939_s27 = smov 0  }
   0x7 LB: > { %4622 = sst [smem:[#allocation5_spill]] %s3825_s24  ;;  %s3954_s28 = sadd.s32 4294967295, %s3837_s27   ;;  %s3837_s27 = sphi %s3939_s27, %s4642_s27   ;;  %s3833_s26 = sphi %s3937_s26, %s4644_s26   ;;  %s3829_s25 = sphi %s3935_s25, %s4646_s25   ;;  %s3825_s24 = sphi %s3933_s24, %s4645_s24  }
   0x8   : > { %4623 = sst [smem:[#allocation6_spill]] %s3833_s26  ;;  %s3200_s29 = sadd.s32 4294967294, %s3837_s27  }
   0x9   : > { %4624 = sst [smem:[#allocation7_spill]] %s3837_s27  ;;  %s3958_s0 = sadd.s32 1, %s3837_s27  }
   0xa   : > { %4625 = sst [smem:[#allocation8_spill]] %s3958_s0  ;;  %s399_s30 = sadd.s32 1, %s3833_s26 }
   0xb   : > { %s396_s18 = ssub.s32 %s3837_s27, %s3958_s0  ;;  %p409_p0 = scmp.ne.s32.totalorder %s3833_s26, %s3829_s25 }
   0xc   : > { %p397_p1 = scmp.eq.s32.totalorder %s396_s18, 0  ;;  %p410_p2 = scmp.eq.s32.totalorder %s3954_s28, 1 }
   0xd   : > { %p415_p3 = scmp.ne.s32.totalorder %s3829_s25, %s3825_s24  ;;  %p416_p4 = scmp.eq.s32.totalorder %s3200_s29, 1 }
   0xe   : > { %s3969_s19 = scalar_select %p397_p1, %s3833_s26, %s399_s30  }
   0xf   : > { %p3971_p5 = por %p410_p2, %p409_p0  ;;  %p3975_p6 = por %p416_p4, %p415_p3 }
  0x10   : > { %4626 = sst [smem:[#allocation9_spill]] %s3969_s19  ;;  %p3203_p7 = scmp.ge.s32.totalorder %s3837_s27, 1 }
  0x11   : > { %s4628_s20 = scalar_select %p3975_p6, 1, 0 }
  0x12   : > { %p489_p8 = scmp.lt.s32.totalorder %s3837_s27, 3 }
  0x13   : > { %4629 = sst [smem:[#allocation10_spill]] %s4628_s20 }
  0x14   : > { %p490_p9 = pnand %p3203_p7, %p489_p8 }
  0x15   : > { %s4630_s23 = sld [smem:[#allocation12_spill]] (!%p490_p9)  ;;  %p539_p10 = scmp.lt.s32.totalorder (!%p490_p9), %s3954_s28, 1 }
  0x16   : > { %493 = sbr.rel (%p490_p9) target bundleno = 5599 (0x15df), region = 88  ;;  %s4631_s27 = sld [smem:[#allocation11_spill]] (!%p490_p9) }
  0x17   : > { %s4632_s2 = sld [smem:[#allocation13_spill]] (!%p490_p9)  ;;  %s3304_s30 = sshll.u32 (!%p490_p9), %s3954_s28, 4 }
  0x1b   : > { %v551_v0 = vld [vmem:[%s4630_s23 + $0x38] sm:$0xff]  ;;  %v3839_v1 = vmov 0.0   ;;  %v550_v2 = vld [vmem:[%s4630_s23 + $0x30] sm:$0xff]  ;;  %vm3840_vm0 = vmmov 0   ;;  %v549_v3 = vld [vmem:[%s4630_s23 + $0x28] sm:$0xff]  ;;  %s540_s22 = scalar_select %p539_p10, %s3954_s28, 1  ;;  %v633_v10 = vlaneseq }
  0x1c   : > { %3424 = vmatprep.subr.mxu0 %v3839_v1  ;;  %3440 = vmatprep.mubr.msk.f32.mxu0 %vm3840_vm0, %v3839_v1  ;;  %v548_v4 = vld [vmem:[%s4630_s23 + $0x20] sm:$0xff]  ;;  %v547_v5 = vld [vmem:[%s4630_s23 + $0x18] sm:$0xff]  ;;  %v546_v6 = vld [vmem:[%s4630_s23 + $0x10] sm:$0xff]  ;;  %vm559_vm1 = vcmask 523264   ;;  %vm657_vm3 = vcmask 258048   ;;  %vm690_vm4 = vcmask 261120  }
  0x1d   : > { %3425 = vmatpush3.msra.mxu0 %v551_v0  ;;  %3443 = vmatprep.subr.mxu1 %v3839_v1  ;;  %s3204_s18 = sshll.u32 %s540_s22, 3  ;;  %v545_v7 = vld [vmem:[%s4630_s23 + $0x8] sm:$0xff]  ;;  %v544_v8 = vld [vmem:[%s4630_s23] sm:$0xff]  ;;  %v634_v11 = vshrl.u32 %v633_v10, 7  ;;  %v689_v25 = vld [vmem:[%s4600_s6 + $0x18] sm:$0xff]  ;;  %v4106_v48 = vand.u32 127, %v633_v10 }
  0x1e   : > { %3426 = vmatprep.subr.mxu0 %v3839_v1  ;;  %3451 = vmatprep.mubr.msk.f32.mxu1 %vm3840_vm0, %v3839_v1  ;;  %s542_s26 = scalar_lea.vmem %s4631_s27, %s3204_s18  ;;  %v3205_v12 = vld [vmem:[%s4632_s2] ss:$0 sm:$0xff]  ;;  %v842_v26 = vld [vmem:[%s4602_s8 + $0x18] sm:$0xff]  ;;  %v688_v27 = vld [vmem:[%s4600_s6 + $0x10] sm:$0xff]  ;;  %vm1093_vm9 = vcmask 1044480   ;;  %vm990_vm10 = vcmask 36864   ;;  %s3143_s27 = scalar_lea.hbm %s4611_s17, %s3304_s30 }
  0x1f   : > { %3427 = vmatpush3.msra.mxu0 %v550_v2  ;;  %v543_v9 = vld [vmem:[%s542_s26] sm:$0x1f]  ;;  %vm635_vm2 = vcmp.eq.s32.totalorder %v634_v11, 0  ;;  %3444 = vmatpush3.msra.mxu1 %v689_v25  ;;  %v841_v28 = vld [vmem:[%s4602_s8 + $0x10] sm:$0xff]  ;;  %v687_v29 = vld [vmem:[%s4600_s6 + $0x8] sm:$0xff]  ;;  %vm646_vm5 = vcmp.ge.s32.totalorder %v4106_v48, 16 }
  0x20   : > { %3428 = vmatprep.subr.mxu0 %v3839_v1  ;;  %v636_v15 = vld [vmem:[%s4597_s3] sm:$0x1f]  ;;  %3445 = vmatprep.subr.mxu1 %v3839_v1  ;;  %v840_v30 = vld [vmem:[%s4602_s8 + $0x8] sm:$0xff]  ;;  %v768_v42 = vld [vmem:[%s4601_s7 + $0x18] sm:$0xff]  ;;  %vm647_vm6 = vcmp.lt.s32.totalorder %v4106_v48, 32  ;;  %vm644_vm7 = vcmp.lt.s32.totalorder %v4106_v48, 16 }
  0x21   : > { %3429 = vmatpush3.msra.mxu0 %v549_v3  ;;  %3446 = vmatpush3.msra.mxu1 %v688_v27  ;;  %v686_v31 = vld [vmem:[%s4600_s6] sm:$0xff]  ;;  %v767_v43 = vld [vmem:[%s4601_s7 + $0x10] sm:$0xff]  ;;  %v766_v44 = vld [vmem:[%s4601_s7 + $0x8] sm:$0xff]  ;;  %vm1089_vm11 = vcmask 39936   ;;  %vm649_vm12 = vcmp.ge.s32.totalorder %v4106_v48, 32  ;;  %vm650_vm13 = vcmp.lt.s32.totalorder %v4106_v48, 48 }
  0x22   : > { %3430 = vmatprep.subr.mxu0 %v3839_v1  ;;  %3447 = vmatprep.subr.mxu1 %v3839_v1  ;;  %v839_v32 = vld [vmem:[%s4602_s8] sm:$0xff]  ;;  %vm4113_vm8 = vmand %vm646_vm5, %vm647_vm6  ;;  %vm652_vm15 = vcmp.ge.s32.totalorder %v4106_v48, 48  ;;  %v3276_v10 = vld [vmem:[%s4603_s9 + $0x68] sm:$0xff]  ;;  %s537_s18 = sand.u32 1, %s3829_s25   ;;  %s3842_s28 = smov [#allocation2]  }
  0x23   : > { %3431 = vmatpush3.msra.mxu0 %v548_v4  ;;  %3448 = vmatpush3.msra.mxu1 %v687_v29  ;;  %v3207_v37 = vld [vmem:[%s4598_s4] ss:$0 sm:$0xff]  ;;  %vm4149_vm14 = vmand %vm649_vm12, %vm650_vm13  ;;  %s538_s26 = scalar_lea.vmem [#allocation2], %s537_s18  ;;  %s3133_s0 = scalar_lea.sflag [#allocation3], %s537_s18 }
  0x24   : > { %3432 = vmatprep.subr.mxu0 %v3839_v1  ;;  %3449 = vmatprep.subr.mxu1 %v3839_v1  ;;  %v3208_v39 = vld [vmem:[%s4599_s5] ss:$0 sm:$0xff]  ;;  %s3145_s19 = sshll.u32 %s538_s26, 4  ;;  %s3781_s21 = sshll.u32 %s3842_s28, 4  ;;  %s3146_s19 = int_to_ptr.vmem [resolvable:$true] %s3145_s19  ;;  %s3782_s21 = int_to_ptr.vmem [resolvable:$false] %s3781_s21 }
  0x25   : > { %3433 = vmatpush3.msra.mxu0 %v547_v5  ;;  %3450 = vmatpush3.msra.mxu1 %v686_v31  ;;  %v765_v45 = vld [vmem:[%s4601_s7] sm:$0xff]  ;;  %s3777_s20 = scalar_lea.vmem %s3146_s19, 16  ;;  %s3783_s29 = scalar_lea.vmem %s3782_s21, 32 }
  0x26   : > { %3434 = vmatprep.subr.mxu0 %v3839_v1  ;;  %3454 = vmatprep.subr.mxu1 %v3839_v1  ;;  %p3778_p11 = scmp.ne.s32.totalorder %s3146_s19, %s3777_s20  ;;  %p3784_p0 = scmp.lt.s32.totalorder %s3146_s19, %s3782_s21 }
  0x27   : > { %3435 = vmatpush3.msra.mxu0 %v546_v6  ;;  %p3785_p1 = scmp.lt.s32.totalorder %s3783_s29, %s3777_s20 }
  0x28   : > { %3436 = vmatprep.subr.mxu0 %v3839_v1  ;;  %p3779_p12 = pnand %p3778_p11, %p3971_p5 }
  0x29   : > { %3437 = vmatpush3.msra.mxu0 %v545_v7  ;;  %p3786_p2 = por %p3785_p1, %p3784_p0 }
  0x2a   : > { %3438 = vmatprep.subr.mxu0 %v3839_v1  ;;  %p3780_p13 = pneg %p3779_p12 }
  0x2b   : > { %3439 = vmatpush3.msra.mxu0 %v544_v8 }
  0x2c   : > { %3441 = vmatmul.mubr.msk.f32.vlgmr.msra.gmra.mxu0 %vm559_vm1, %v543_v9  ;;  %3465 = vmatprep.subr.mxu0 %v3839_v1  ;;  %p3787_p3 = pnand %p3786_p2, %p3780_p13 }
  0x2d   : > { %3473 = vmatprep.mubr.msk.f32.mxu0 %vm3840_vm0, %v3839_v1  ;;  %3466 = vmatpush3.msra.mxu0 %v842_v26 }
  0x2e   : > { %3467 = vmatprep.subr.mxu0 %v3839_v1 }
  0x2f   : > { %3468 = vmatpush3.msra.mxu0 %v841_v28 }
  0x30   : > { %3469 = vmatprep.subr.mxu0 %v3839_v1 }
  0x31   : > { %3470 = vmatpush3.msra.mxu0 %v840_v30 }
  0x32   : > { %3471 = vmatprep.subr.mxu0 %v3839_v1 }
  0x33   : > { %3472 = vmatpush3.msra.mxu0 %v839_v32 }
  0x34   : > { %3476 = vmatprep.subr.mxu0 %v3839_v1 }
  0xec   : > { %v629_v13 = vpop.f32.mrf.mxu0 }
  0xed   : > { %v630_v14 = vadd.f32 %v3205_v12, %v629_v13  ;;  %v3274_v12 = vld [vmem:[%s4603_s9 + $0x58] sm:$0xff] }
  0xee   : > { %v3442_v16 = vpop.f32.mrf.mxu0 }
  0xef   : > { %v639_v17 = vsel %vm635_vm2, 0.0, %v630_v14  ;;  %vm653_vm2 = vcmp.lt.s32.totalorder %v4106_v48, 64 }
  0xf0   : > { %v4034_v18 = vadd.f32 %v639_v17, %v636_v15  ;;  %vm4161_vm5 = vmand %vm652_vm15, %vm653_vm2 }
  0xf2   : > { %v658_v19 = vsel %vm657_vm3, %v4034_v18, 0.0 }
  0xf3   : > { %659 = vadd.xlane.f32.xlu0 %v658_v19 }
 0x17c   : > { %v660_v20 = vpop.xlane.xlu0 %659 }
 0x17d   : > { %v662_v21 = vmul.f32 0.03125, %v660_v20 }
 0x17f   : > { %v663_v22 = vsub.f32 %v4034_v18, %v662_v21 }
 0x181   : > { %v664_v23 = vmul.f32 %v663_v22, %v663_v22 }
 0x183   : > { %v665_v24 = vsel %vm657_vm3, %v664_v23, 0.0 }
 0x184   : > { %666 = vadd.xlane.f32.xlu0 %v665_v24 }
 0x20d   : > { %v667_v33 = vpop.xlane.xlu0 %666 }
 0x20e   : > { %v668_v34 = vmul.f32 0.03125, %v667_v33 }
 0x210   : > { %v669_v35 = vadd.f32 1e-05, %v668_v34 }
 0x212   : > { %3729 = vrsqrt.f32 %v669_v35 }
 0x21f   : > { %v3730_v36 = vpop.eup %3729 }
 0x220   : > { %v671_v38 = vmul.f32 %v3730_v36, %v663_v22 }
 0x222   : > { %v678_v40 = vmul.f32 %v3207_v37, %v671_v38 }
 0x224   : > { %v685_v41 = vadd.f32 %v3208_v39, %v678_v40 }
 0x226   : > { %3452 = vmatmul.mubr.msk.f32.vlgmr.msra.gmra.mxu1 %vm690_vm4, %v685_v41  ;;  %3474 = vmatmul.mubr.msk.f32.vlgmr.msra.gmra.mxu0 %vm690_vm4, %v685_v41 }
 0x227   : > { %3455 = vmatpush3.msra.mxu1 %v768_v42  ;;  %3462 = vmatprep.mubr.msk.f32.mxu1 %vm3840_vm0, %v3839_v1  ;;  %v1576_v42 = vld [vmem:[%s4603_s9 + $0x38] sm:$0xff] }
 0x228   : > { %3456 = vmatprep.subr.mxu1 %v3839_v1  ;;  %3478 = vmatprep.mubr.msk.f32.mxu0 %vm3840_vm0, %v3839_v1 }
 0x229   : > { %3457 = vmatpush3.msra.mxu1 %v767_v43  ;;  %v1575_v43 = vld [vmem:[%s4603_s9 + $0x30] sm:$0xff] }
 0x22a   : > { %3458 = vmatprep.subr.mxu1 %v3839_v1 }
 0x22b   : > { %3459 = vmatpush3.msra.mxu1 %v766_v44  ;;  %v1574_v44 = vld [vmem:[%s4603_s9 + $0x28] sm:$0xff] }
 0x22c   : > { %3460 = vmatprep.subr.mxu1 %v3839_v1 }
 0x22d   : > { %3461 = vmatpush3.msra.mxu1 %v765_v45  ;;  %v1573_v45 = vld [vmem:[%s4603_s9 + $0x20] sm:$0xff] }
 0x22e   : > { %3463 = vmatmul.mubr.msk.f32.vlgmr.msra.gmra.mxu1 %vm690_vm4, %v685_v41  ;;  %3481 = vmatprep.subr.mxu1 %v3839_v1 }
 0x22f   : > { %3483 = vmatprep.mubr.msk.f32.mxu1 %vm3840_vm0, %v3839_v1 }
 0x2e6   : > { %v760_v46 = vpop.f32.mrf.mxu1  ;;  %v4103_v47 = vpop.f32.mrf.mxu0 }
 0x2e7   : > { %v764_v51 = vmul.f32 0.25, %v760_v46  ;;  %v1088_v57 = vsel %vm4113_vm8, %v4103_v47, 0.0  ;;  %v1002_v58 = vsel %vm644_vm7, %v4103_v47, 0.0  ;;  %v1328_v40 = vsel %vm4149_vm14, %v4103_v47, 0.0 }
 0x2e8   : > { %v3453_v49 = vpop.f32.mrf.mxu1  ;;  %v3475_v50 = vpop.f32.mrf.mxu0 }
 0x2e9   : > { %v913_v55 = vsel %vm644_vm7, %v764_v51, 0.0  ;;  %v1003_v56 = vsel %vm4113_vm8, %v764_v51, 0.0  ;;  %v1243_v11 = vsel %vm4149_vm14, %v764_v51, 0.0  ;;  %v1406_v13 = vsel %vm4161_vm5, %v764_v51, 0.0 }
 0x2ee   : > { %v835_v52 = vpop.f32.mrf.mxu1 }
 0x2ef   : > { %3477 = vmatpush3.xpose.msk.msra.mxu0 %vm559_vm1, %v835_v52  ;;  %3482 = vmatpush3.xpose.msk.msra.mxu1 %vm559_vm1, %v835_v52 }
 0x2f0   : > { %v3464_v54 = vpop.f32.mrf.mxu1  ;;  %3486 = vmatprep.subr.mxu0 %v3839_v1  ;;  %3491 = vmatprep.subr.mxu1 %v3839_v1 }
 0x2f2   : > { %3479 = vmatmul.mubr.msk.f32.vlgmr.msra.gmra.mxu0 %vm559_vm1, %v913_v55  ;;  %3484 = vmatmul.mubr.msk.f32.vlgmr.msra.gmra.mxu1 %vm559_vm1, %v1003_v56 }
 0x2f3   : > { %3487 = vmatpush3.msk.msra.mxu0 %vm1093_vm9, %v1088_v57  ;;  %3492 = vmatpush3.msk.msra.mxu1 %vm1093_vm9, %v1002_v58  ;;  %v1571_v58 = vld [vmem:[%s4603_s9 + $0x10] sm:$0xff] }
 0x2f4   : > { %3488 = vmatprep.mubr.msk.f32.mxu0 %vm3840_vm0, %v3839_v1  ;;  %3496 = vmatprep.subr.mxu0 %v3839_v1 }
 0x2f5   : > { %3493 = vmatprep.mubr.msk.f32.mxu1 %vm3840_vm0, %v3839_v1  ;;  %3501 = vmatprep.subr.mxu1 %v3839_v1 }
 0x3b2   : > { %v986_v59 = vpop.f32.mrf.mxu0  ;;  %v1073_v60 = vpop.f32.mrf.mxu1 }
 0x3b3   : > { %v1077_v61 = vsel %vm990_vm10, %v1073_v60, -inf  ;;  %v991_v62 = vsel %vm990_vm10, %v986_v59, -inf }
 0x3b4   : > { %1078 = vmax.xlane.f32.xlu1 %v1077_v61  ;;  %v3485_v63 = vpop.f32.mrf.mxu1  ;;  %992 = vmax.xlane.f32.xlu0 %v991_v62  ;;  %v3480_v0 = vpop.f32.mrf.mxu0 }
 0x43d   : > { %v1079_v2 = vpop.xlane.xlu1 %1078  ;;  %v993_v14 = vpop.xlane.xlu0 %992 }
 0x43e   : > { %v1080_v3 = vsub.f32 %v1073_v60, %v1079_v2  ;;  %v994_v15 = vsub.f32 %v986_v59, %v993_v14  ;;  %v1570_v59 = vld [vmem:[%s4603_s9 + $0x8] sm:$0xff]  ;;  %v1569_v60 = vld [vmem:[%s4603_s9] sm:$0xff] }
 0x440   : > { %v1081_v4 = vmul.f32 1.442695, %v1080_v3  ;;  %v995_v16 = vmul.f32 1.442695, %v994_v15 }
 0x442   : > { %3731 = vpow2.f32 %v1081_v4 }
 0x44f   : > { %v3732_v5 = vpop.eup %3731 }
 0x450   : > { %v1083_v6 = vsel %vm990_vm10, %v3732_v5, 0.0 }
 0x451   : > { %1084 = vadd.xlane.f32.xlu1 %v1083_v6  ;;  %v3229_v6 = vld [vmem:[%s4604_s10] ss:$0 sm:$0xff] }
 0x4da   : > { %v1085_v7 = vpop.xlane.xlu1 %1084 }
 0x4db   : > { %3733 = vrcp.f32 %v1085_v7 }
 0x4dc   : > { %3735 = vpow2.f32 %v995_v16 }
 0x4e8   : > { %v3734_v8 = vpop.eup %3733 }
 0x4e9   : > { %v1087_v9 = vmul.f32 %v3734_v8, %v3732_v5  ;;  %v3736_v22 = vpop.eup %3735 }
 0x4ea   : > { %v997_v25 = vsel %vm990_vm10, %v3736_v22, 0.0 }
 0x4eb   : > { %3489 = vmatmul.mubr.msk.f32.vlgmr.msra.gmra.mxu0 %vm1089_vm11, %v1087_v9 }
 0x4ec   : > { %3497 = vmatpush3.xpose.msk.msra.mxu0 %vm559_vm1, %v835_v52  ;;  %3498 = vmatprep.mubr.msk.f32.mxu0 %vm3840_vm0, %v3839_v1 }
 0x4ed   : > { %3506 = vmatprep.subr.mxu0 %v3839_v1 }
 0x4ef   : > { %3499 = vmatmul.mubr.msk.f32.vlgmr.msra.gmra.mxu0 %vm559_vm1, %v1243_v11 }
 0x4f0   : > { %3507 = vmatpush3.xpose.msk.msra.mxu0 %vm559_vm1, %v835_v52  ;;  %3508 = vmatprep.mubr.msk.f32.mxu0 %vm3840_vm0, %v3839_v1  ;;  %v1491_v52 = vsel %vm4161_vm5, %v4103_v47, 0.0  ;;  %v1572_v47 = vld [vmem:[%s4603_s9 + $0x18] sm:$0xff] }
 0x4f1   : > { %3516 = vmatprep.subr.mxu0 %v3839_v1 }
 0x4f3   : > { %3509 = vmatmul.mubr.msk.f32.vlgmr.msra.gmra.mxu0 %vm559_vm1, %v1406_v13 }
 0x4f4   : > { %3532 = vmatprep.mubr.msk.f32.mxu0 %vm3840_vm0, %v3839_v1  ;;  %3517 = vmatpush3.msra.mxu0 %v1576_v42 }
 0x4f5   : > { %3518 = vmatprep.subr.mxu0 %v3839_v1 }
 0x4f6   : > { %3519 = vmatpush3.msra.mxu0 %v1575_v43 }
 0x4f7   : > { %3520 = vmatprep.subr.mxu0 %v3839_v1 }
 0x4f8   : > { %3521 = vmatpush3.msra.mxu0 %v1574_v44 }
 0x4f9   : > { %3522 = vmatprep.subr.mxu0 %v3839_v1 }
 0x4fa   : > { %3523 = vmatpush3.msra.mxu0 %v1573_v45 }
 0x4fb   : > { %3524 = vmatprep.subr.mxu0 %v3839_v1 }
 0x4fc   : > { %3525 = vmatpush3.msra.mxu0 %v1572_v47 }
 0x4fd   : > { %3526 = vmatprep.subr.mxu0 %v3839_v1 }
 0x4fe   : > { %3527 = vmatpush3.msra.mxu0 %v1571_v58 }
 0x4ff   : > { %3528 = vmatprep.subr.mxu0 %v3839_v1 }
 0x500   : > { %3529 = vmatpush3.msra.mxu0 %v1570_v59 }
 0x501   : > { %3530 = vmatprep.subr.mxu0 %v3839_v1 }
 0x502   : > { %3531 = vmatpush3.msra.mxu0 %v1569_v60 }
 0x503   : > { %3565 = vmatprep.subr.mxu0 %v3839_v1 }
 0x5ab   : > { %v4171_v17 = vpop.f32.mrf.mxu0 }
 0x5ad   : > { %v3490_v19 = vpop.f32.mrf.mxu0 }
 0x5ae   : > { %v1691_v19 = vld [vmem:[%s4607_s13 + $0x18] sm:$0xff] }
 0x5af   : > { %v1313_v20 = vpop.f32.mrf.mxu0 }
 0x5b0   : > { %v1317_v21 = vsel %vm990_vm10, %v1313_v20, -inf }
 0x5b1   : > { %1318 = vmax.xlane.f32.xlu1 %v1317_v21  ;;  %v3500_v23 = vpop.f32.mrf.mxu0  ;;  %v1688_v21 = vld [vmem:[%s4607_s13] sm:$0xff] }
 0x5b3   : > { %v1476_v24 = vpop.f32.mrf.mxu0 }
 0x5b4   : > { %v1480_v26 = vsel %vm990_vm10, %v1476_v24, -inf }
 0x5b5   : > { %998 = vadd.xlane.f32.xlu1 %v997_v25  ;;  %1481 = vmax.xlane.f32.xlu0 %v1480_v26  ;;  %v3510_v27 = vpop.f32.mrf.mxu0  ;;  %v3230_v26 = vld [vmem:[%s4605_s11] ss:$0 sm:$0xff] }
 0x63a   : > { %v1319_v28 = vpop.xlane.xlu1 %1318 }
 0x63b   : > { %v1320_v29 = vsub.f32 %v1313_v20, %v1319_v28  ;;  %v1689_v20 = vld [vmem:[%s4607_s13 + $0x8] sm:$0xff]  ;;  %v3231_v28 = vld [vmem:[%s4606_s12] ss:$0 sm:$0xff] }
 0x63d   : > { %v1321_v30 = vmul.f32 1.442695, %v1320_v29 }
 0x63e   : > { %v999_v31 = vpop.xlane.xlu1 %998  ;;  %v1482_v32 = vpop.xlane.xlu0 %1481 }
 0x63f   : > { %3737 = vpow2.f32 %v1321_v30  ;;  %v1483_v33 = vsub.f32 %v1476_v24, %v1482_v32  ;;  %v1805_v32 = vld [vmem:[%s4609_s15 + $0x30] sm:$0xff] }
 0x640   : > { %3739 = vrcp.f32 %v999_v31  ;;  %v1806_v31 = vld [vmem:[%s4609_s15 + $0x38] sm:$0xff] }
 0x641   : > { %v1484_v34 = vmul.f32 1.442695, %v1483_v33  ;;  %v1804_v33 = vld [vmem:[%s4609_s15 + $0x28] sm:$0xff] }
 0x643   : > { %3741 = vpow2.f32 %v1484_v34  ;;  %v1803_v34 = vld [vmem:[%s4609_s15 + $0x20] sm:$0xff] }
 0x64c   : > { %v3738_v35 = vpop.eup %3737 }
 0x64d   : > { %v3740_v36 = vpop.eup %3739  ;;  %v1323_v37 = vsel %vm990_vm10, %v3738_v35, 0.0 }
 0x64e   : > { %1324 = vadd.xlane.f32.xlu0 %v1323_v37  ;;  %v1001_v38 = vmul.f32 %v3740_v36, %v3736_v22  ;;  %v1801_v36 = vld [vmem:[%s4609_s15 + $0x10] sm:$0xff]  ;;  %v1800_v37 = vld [vmem:[%s4609_s15 + $0x8] sm:$0xff] }
 0x650   : > { %v3742_v39 = vpop.eup %3741  ;;  %3494 = vmatmul.mubr.msk.f32.vlgmr.msra.gmra.mxu1 %vm1089_vm11, %v1001_v38  ;;  %v1799_v38 = vld [vmem:[%s4609_s15] sm:$0xff] }
 0x651   : > { %3502 = vmatpush3.msk.msra.mxu1 %vm1093_vm9, %v1328_v40  ;;  %v1486_v41 = vsel %vm990_vm10, %v3742_v39, 0.0  ;;  %3503 = vmatprep.mubr.msk.f32.mxu1 %vm3840_vm0, %v3839_v1 }
 0x652   : > { %1487 = vadd.xlane.f32.xlu1 %v1486_v41  ;;  %3511 = vmatprep.subr.mxu1 %v3839_v1 }
 0x6d7   : > { %v1325_v46 = vpop.xlane.xlu0 %1324 }
 0x6d8   : > { %3743 = vrcp.f32 %v1325_v46 }
 0x6db   : > { %v1488_v49 = vpop.xlane.xlu1 %1487 }
 0x6dc   : > { %3745 = vrcp.f32 %v1488_v49 }
 0x6e5   : > { %v3744_v50 = vpop.eup %3743 }
 0x6e6   : > { %v1327_v51 = vmul.f32 %v3744_v50, %v3738_v35  ;;  %v1802_v35 = vld [vmem:[%s4609_s15 + $0x18] sm:$0xff] }
 0x6e8   : > { %3504 = vmatmul.mubr.msk.f32.vlgmr.msra.gmra.mxu1 %vm1089_vm11, %v1327_v51 }
 0x6e9   : > { %v3746_v54 = vpop.eup %3745  ;;  %3512 = vmatpush3.msk.msra.mxu1 %vm1093_vm9, %v1491_v52  ;;  %3513 = vmatprep.mubr.msk.f32.mxu1 %vm3840_vm0, %v3839_v1 }
 0x6ea   : > { %v1490_v55 = vmul.f32 %v3746_v54, %v3742_v39  ;;  %3535 = vmatprep.subr.mxu1 %v3839_v1  ;;  %v3232_v39 = vld [vmem:[%s4608_s14] ss:$0 sm:$0xff] }
 0x6ec   : > { %3514 = vmatmul.mubr.msk.f32.vlgmr.msra.gmra.mxu1 %vm1089_vm11, %v1490_v55 }
 0x6ed   : > { %3543 = vmatprep.mubr.msk.f32.mxu1 %vm3840_vm0, %v3839_v1  ;;  %3536 = vmatpush3.msra.mxu1 %v1691_v19 }
 0x6ee   : > { %3537 = vmatprep.subr.mxu1 %v3839_v1 }
 0x710   : > { %v1239_v56 = vpop.f32.mrf.mxu1 }
 0x711   : > { %v1240_v62 = vadd.f32 %v1239_v56, %v4171_v17 }
 0x712   : > { %v3495_v57 = vpop.f32.mrf.mxu1 }
 0x7a8   : > { %v1401_v61 = vpop.f32.mrf.mxu1 }
 0x7a9   : > { %v1405_v0 = vadd.f32 %v1401_v61, %v1240_v62 }
 0x7aa   : > { %v3505_v63 = vpop.f32.mrf.mxu1 }
 0x7ac   : > { %v1564_v2 = vpop.f32.mrf.mxu1 }
 0x7ad   : > { %v1568_v3 = vadd.f32 %v1564_v2, %v1405_v0  ;;  %v3841_v2 = vmov 1.0  }
 0x7ae   : > { %v3515_v4 = vpop.f32.mrf.mxu1 }
 0x7af   : > { %3533 = vmatmul.mubr.msk.f32.vlgmr.msra.gmra.mxu0 %vm559_vm1, %v1568_v3 }
 0x7b0   : > { %3573 = vmatprep.mubr.msk.f32.mxu0 %vm3840_vm0, %v3839_v1 }
 0x86f   : > { %v1646_v5 = vpop.f32.mrf.mxu0 }
 0x870   : > { %v1650_v7 = vadd.f32 %v1646_v5, %v4034_v18  ;;  %v1690_v18 = vld [vmem:[%s4607_s13 + $0x10] sm:$0xff] }
 0x871   : > { %v3534_v8 = vpop.f32.mrf.mxu0  ;;  %3538 = vmatpush3.msra.mxu1 %v1690_v18 }
 0x872   : > { %v4237_v9 = vadd.f32 %v3229_v6, %v1650_v7  ;;  %3539 = vmatprep.subr.mxu1 %v3839_v1 }
 0x873   : > { %3540 = vmatpush3.msra.mxu1 %v1689_v20 }
 0x874   : > { %v1661_v11 = vsel %vm657_vm3, %v4237_v9, 0.0  ;;  %3541 = vmatprep.subr.mxu1 %v3839_v1 }
 0x875   : > { %1662 = vadd.xlane.f32.xlu0 %v1661_v11  ;;  %3542 = vmatpush3.msra.mxu1 %v1688_v21  ;;  %v3235_v11 = vld [vmem:[%s4610_s16] ss:$0 sm:$0xff] }
 0x876   : > { %3546 = vmatprep.subr.mxu1 %v3839_v1 }
 0x8fe   : > { %v1663_v13 = vpop.xlane.xlu0 %1662 }
 0x8ff   : > { %v1664_v14 = vmul.f32 0.03125, %v1663_v13 }
 0x901   : > { %v1665_v15 = vsub.f32 %v4237_v9, %v1664_v14 }
 0x903   : > { %v1666_v16 = vmul.f32 %v1665_v15, %v1665_v15 }
 0x905   : > { %v1667_v17 = vsel %vm657_vm3, %v1666_v16, 0.0 }
 0x906   : > { %1668 = vadd.xlane.f32.xlu1 %v1667_v17 }
 0x98f   : > { %v1669_v22 = vpop.xlane.xlu1 %1668 }
 0x990   : > { %v1670_v23 = vmul.f32 0.03125, %v1669_v22  ;;  %v3243_v22 = vld [vmem:[%s4600_s6 + $0x38] sm:$0xff] }
 0x991   : > { %3566 = vmatpush3.msra.mxu0 %v3243_v22 }
 0x992   : > { %v1671_v24 = vadd.f32 1e-05, %v1670_v23  ;;  %v3242_v23 = vld [vmem:[%s4600_s6 + $0x30] sm:$0xff]  ;;  %3567 = vmatprep.subr.mxu0 %v3839_v1 }
 0x993   : > { %3568 = vmatpush3.msra.mxu0 %v3242_v23 }
 0x994   : > { %3747 = vrsqrt.f32 %v1671_v24  ;;  %v3252_v24 = vld [vmem:[%s4602_s8 + $0x30] sm:$0xff]  ;;  %3569 = vmatprep.subr.mxu0 %v3839_v1 }
 0x9a1   : > { %v3748_v25 = vpop.eup %3747 }
 0x9a2   : > { %v1673_v27 = vmul.f32 %v3748_v25, %v1665_v15  ;;  %v3241_v25 = vld [vmem:[%s4600_s6 + $0x28] sm:$0xff] }
 0x9a3   : > { %3570 = vmatpush3.msra.mxu0 %v3241_v25 }
 0x9a4   : > { %v1680_v29 = vmul.f32 %v3230_v26, %v1673_v27  ;;  %v3251_v26 = vld [vmem:[%s4602_s8 + $0x28] sm:$0xff]  ;;  %v3240_v27 = vld [vmem:[%s4600_s6 + $0x20] sm:$0xff]  ;;  %3571 = vmatprep.subr.mxu0 %v3839_v1 }
 0x9a5   : > { %3572 = vmatpush3.msra.mxu0 %v3240_v27 }
 0x9a6   : > { %v1687_v30 = vadd.f32 %v3231_v28, %v1680_v29  ;;  %v3250_v28 = vld [vmem:[%s4602_s8 + $0x20] sm:$0xff]  ;;  %3576 = vmatprep.subr.mxu0 %v3839_v1 }
 0x9a8   : > { %3544 = vmatmul.mubr.msk.f32.vlgmr.msra.gmra.mxu1 %vm690_vm4, %v1687_v30 }
 0x9a9   : > { %3562 = vmatprep.mubr.msk.f32.mxu1 %vm3840_vm0, %v3839_v1  ;;  %3547 = vmatpush3.msra.mxu1 %v1806_v31 }
 0x9aa   : > { %3548 = vmatprep.subr.mxu1 %v3839_v1 }
 0x9ab   : > { %3549 = vmatpush3.msra.mxu1 %v1805_v32 }
 0x9ac   : > { %3550 = vmatprep.subr.mxu1 %v3839_v1 }
 0x9ad   : > { %3551 = vmatpush3.msra.mxu1 %v1804_v33  ;;  %v3238_v33 = vld [vmem:[%s4598_s4 + $0x1] ss:$0 sm:$0xff] }
 0x9ae   : > { %3552 = vmatprep.subr.mxu1 %v3839_v1 }
 0x9af   : > { %3553 = vmatpush3.msra.mxu1 %v1803_v34 }
 0x9b0   : > { %3554 = vmatprep.subr.mxu1 %v3839_v1 }
 0x9b1   : > { %3555 = vmatpush3.msra.mxu1 %v1802_v35  ;;  %v3239_v35 = vld [vmem:[%s4599_s5 + $0x1] ss:$0 sm:$0xff] }
 0x9b2   : > { %3556 = vmatprep.subr.mxu1 %v3839_v1 }
 0x9b3   : > { %3557 = vmatpush3.msra.mxu1 %v1801_v36 }
 0x9b4   : > { %3558 = vmatprep.subr.mxu1 %v3839_v1 }
 0x9b5   : > { %3559 = vmatpush3.msra.mxu1 %v1800_v37 }
 0x9b6   : > { %3560 = vmatprep.subr.mxu1 %v3839_v1 }
 0x9b7   : > { %3561 = vmatpush3.msra.mxu1 %v1799_v38  ;;  %v3248_v38 = vld [vmem:[%s4601_s7 + $0x38] sm:$0xff] }
 0x9b8   : > { %3587 = vmatprep.subr.mxu1 %v3839_v1 }
 0xa68   : > { %v1768_v40 = vpop.f32.mrf.mxu1 }
 0xa69   : > { %v1769_v41 = vadd.f32 %v3232_v39, %v1768_v40  ;;  %v3247_v39 = vld [vmem:[%s4601_s7 + $0x30] sm:$0xff]  ;;  %v3246_v40 = vld [vmem:[%s4601_s7 + $0x28] sm:$0xff] }
 0xa6a   : > { %v3545_v42 = vpop.f32.mrf.mxu1 }
 0xa6b   : > { %v1773_v43 = vmul.f32 0.70710677, %v1769_v41  ;;  %v1772_v5 = vmul.f32 0.5, %v1769_v41  ;;  %v3245_v41 = vld [vmem:[%s4601_s7 + $0x20] sm:$0xff] }
 0xa6d   : > { %v1776_v44 = vand.u32 2147483647, %v1773_v43  ;;  %vm1774_vm6 = vcmp.lt.f32.partialorder %v1773_v43, 0.0 }
 0xa6e   : > { %v1775_v3 = vsel %vm1774_vm6, -1.0, %v3841_v2 }
 0xa6f   : > { %v1777_v45 = vmul.f32 0.3275911, %v1776_v44  ;;  %v1790_v49 = vsub.f32 0.0, %v1776_v44 }
 0xa71   : > { %v1778_v46 = vadd.f32 1.0, %v1777_v45  ;;  %v1791_v50 = vmul.f32 %v1790_v49, %v1776_v44 }
 0xa73   : > { %3749 = vrcp.f32 %v1778_v46  ;;  %v1792_v54 = vmul.f32 1.442695, %v1791_v50 }
 0xa75   : > { %3751 = vpow2.f32 %v1792_v54 }
 0xa80   : > { %v3750_v51 = vpop.eup %3749 }
 0xa81   : > { %v1781_v52 = vmul.f32 1.0614054, %v3750_v51 }
 0xa82   : > { %v3752_v62 = vpop.eup %3751 }
 0xa83   : > { %v1782_v55 = vadd.f32 -1.4531521, %v1781_v52 }
 0xa85   : > { %v1783_v56 = vmul.f32 %v3750_v51, %v1782_v55 }
 0xa87   : > { %v1784_v57 = vadd.f32 1.4214138, %v1783_v56 }
 0xa89   : > { %v1785_v47 = vmul.f32 %v3750_v51, %v1784_v57 }
 0xa8b   : > { %v1786_v58 = vadd.f32 -0.28449672, %v1785_v47 }
 0xa8d   : > { %v1787_v59 = vmul.f32 %v3750_v51, %v1786_v58 }
 0xa8f   : > { %v1788_v60 = vadd.f32 0.2548296, %v1787_v59 }
 0xa91   : > { %v1789_v61 = vmul.f32 %v3750_v51, %v1788_v60 }
 0xa93   : > { %v1794_v63 = vmul.f32 %v3752_v62, %v1789_v61 }
 0xa95   : > { %v1795_v0 = vsub.f32 1.0, %v1794_v63 }
 0xa97   : > { %v1796_v4 = vmul.f32 %v1795_v0, %v1775_v3 }
 0xa99   : > { %v1797_v6 = vadd.f32 1.0, %v1796_v4 }
 0xa9b   : > { %v1798_v7 = vmul.f32 %v1797_v6, %v1772_v5 }
 0xa9d   : > { %3563 = vmatmul.mubr.msk.f32.vlgmr.msra.gmra.mxu1 %vm559_vm1, %v1798_v7 }
 0xa9e   : > { %3595 = vmatprep.mubr.msk.f32.mxu1 %vm3840_vm0, %v3839_v1 }
 0xb5d   : > { %v1876_v8 = vpop.f32.mrf.mxu1 }
 0xb5e   : > { %v1880_v13 = vadd.f32 %v1876_v8, %v4237_v9  ;;  %v3253_v9 = vld [vmem:[%s4602_s8 + $0x38] sm:$0xff] }
 0xb5f   : > { %v3564_v14 = vpop.f32.mrf.mxu1  ;;  %3588 = vmatpush3.msra.mxu1 %v3253_v9 }
 0xb60   : > { %v4311_v15 = vadd.f32 %v3235_v11, %v1880_v13  ;;  %3589 = vmatprep.subr.mxu1 %v3839_v1 }
 0xb61   : > { %3590 = vmatpush3.msra.mxu1 %v3252_v24 }
 0xb62   : > { %v1893_v16 = vsel %vm657_vm3, %v4311_v15, 0.0  ;;  %3591 = vmatprep.subr.mxu1 %v3839_v1 }
 0xb63   : > { %1894 = vadd.xlane.f32.xlu0 %v1893_v16  ;;  %3592 = vmatpush3.msra.mxu1 %v3251_v26 }
 0xb64   : > { %3593 = vmatprep.subr.mxu1 %v3839_v1 }
 0xb65   : > { %3594 = vmatpush3.msra.mxu1 %v3250_v28 }
 0xb66   : > { %3603 = vmatprep.subr.mxu1 %v3839_v1 }
 0xbec   : > { %v1895_v17 = vpop.xlane.xlu0 %1894 }
 0xbed   : > { %v1896_v19 = vmul.f32 0.03125, %v1895_v17 }
 0xbef   : > { %v1897_v18 = vsub.f32 %v4311_v15, %v1896_v19 }
 0xbf1   : > { %v1898_v20 = vmul.f32 %v1897_v18, %v1897_v18 }
 0xbf3   : > { %v1899_v21 = vsel %vm657_vm3, %v1898_v20, 0.0 }
 0xbf4   : > { %1900 = vadd.xlane.f32.xlu1 %v1899_v21 }
 0xc7d   : > { %v1901_v29 = vpop.xlane.xlu1 %1900 }
 0xc7e   : > { %v1902_v30 = vmul.f32 0.03125, %v1901_v29 }
 0xc80   : > { %v1903_v31 = vadd.f32 1e-05, %v1902_v30 }
 0xc82   : > { %3753 = vrsqrt.f32 %v1903_v31 }
 0xc8f   : > { %v3754_v32 = vpop.eup %3753 }
 0xc90   : > { %v1905_v34 = vmul.f32 %v3754_v32, %v1897_v18 }
 0xc92   : > { %v1912_v36 = vmul.f32 %v3238_v33, %v1905_v34 }
 0xc94   : > { %v1919_v37 = vadd.f32 %v3239_v35, %v1912_v36 }
 0xc96   : > { %3574 = vmatmul.mubr.msk.f32.vlgmr.msra.gmra.mxu0 %vm690_vm4, %v1919_v37  ;;  %3596 = vmatmul.mubr.msk.f32.vlgmr.msra.gmra.mxu1 %vm690_vm4, %v1919_v37 }
 0xc97   : > { %3577 = vmatpush3.msra.mxu0 %v3248_v38  ;;  %3584 = vmatprep.mubr.msk.f32.mxu0 %vm3840_vm0, %v3839_v1  ;;  %v3277_v38 = vld [vmem:[%s4603_s9 + $0x70] sm:$0xff] }
 0xc98   : > { %3578 = vmatprep.subr.mxu0 %v3839_v1  ;;  %3605 = vmatprep.mubr.msk.f32.mxu1 %vm3840_vm0, %v3839_v1 }
 0xc99   : > { %3579 = vmatpush3.msra.mxu0 %v3247_v39  ;;  %v3275_v39 = vld [vmem:[%s4603_s9 + $0x60] sm:$0xff] }
 0xc9a   : > { %3580 = vmatprep.subr.mxu0 %v3839_v1 }
 0xc9b   : > { %3581 = vmatpush3.msra.mxu0 %v3246_v40 }
 0xc9c   : > { %3582 = vmatprep.subr.mxu0 %v3839_v1 }
 0xc9d   : > { %3583 = vmatpush3.msra.mxu0 %v3245_v41 }
 0xc9e   : > { %3585 = vmatmul.mubr.msk.f32.vlgmr.msra.gmra.mxu0 %vm690_vm4, %v1919_v37  ;;  %3598 = vmatprep.subr.mxu0 %v3839_v1  ;;  %v3278_v37 = vld [vmem:[%s4603_s9 + $0x78] sm:$0xff] }
 0xc9f   : > { %3600 = vmatprep.mubr.msk.f32.mxu0 %vm3840_vm0, %v3839_v1 }
 0xd56   : > { %v1994_v42 = vpop.f32.mrf.mxu0  ;;  %v4380_v43 = vpop.f32.mrf.mxu1 }
 0xd57   : > { %v1998_v46 = vmul.f32 0.25, %v1994_v42  ;;  %v2323_v54 = vsel %vm4113_vm8, %v4380_v43, 0.0  ;;  %v2237_v55 = vsel %vm644_vm7, %v4380_v43, 0.0  ;;  %v2561_v35 = vsel %vm4149_vm14, %v4380_v43, 0.0 }
 0xd58   : > { %v3575_v44 = vpop.f32.mrf.mxu0  ;;  %v3597_v45 = vpop.f32.mrf.mxu1 }
 0xd59   : > { %v2149_v51 = vsel %vm644_vm7, %v1998_v46, 0.0  ;;  %v2238_v52 = vsel %vm4113_vm8, %v1998_v46, 0.0  ;;  %v2476_v5 = vsel %vm4149_vm14, %v1998_v46, 0.0  ;;  %v2639_v6 = vsel %vm4161_vm5, %v1998_v46, 0.0 }
 0xd5a   : > { %v2724_v45 = vsel %vm4161_vm5, %v4380_v43, 0.0  ;;  %v3273_v43 = vld [vmem:[%s4603_s9 + $0x50] sm:$0xff] }
 0xd5e   : > { %v2070_v49 = vpop.f32.mrf.mxu0 }
 0xd5f   : > { %3599 = vmatpush3.xpose.msk.msra.mxu0 %vm559_vm1, %v2070_v49  ;;  %3604 = vmatpush3.xpose.msk.msra.mxu1 %vm559_vm1, %v2070_v49 }
 0xd60   : > { %v3586_v50 = vpop.f32.mrf.mxu0  ;;  %3608 = vmatprep.subr.mxu0 %v3839_v1  ;;  %3613 = vmatprep.subr.mxu1 %v3839_v1 }
 0xd62   : > { %3601 = vmatmul.mubr.msk.f32.vlgmr.msra.gmra.mxu0 %vm559_vm1, %v2149_v51  ;;  %3606 = vmatmul.mubr.msk.f32.vlgmr.msra.gmra.mxu1 %vm559_vm1, %v2238_v52  ;;  %v3272_v52 = vld [vmem:[%s4603_s9 + $0x48] sm:$0xff] }
 0xd63   : > { %3609 = vmatpush3.msk.msra.mxu0 %vm1093_vm9, %v2323_v54  ;;  %3614 = vmatpush3.msk.msra.mxu1 %vm1093_vm9, %v2237_v55  ;;  %v3271_v54 = vld [vmem:[%s4603_s9 + $0x40] sm:$0xff] }
 0xd64   : > { %3610 = vmatprep.mubr.msk.f32.mxu0 %vm3840_vm0, %v3839_v1  ;;  %3618 = vmatprep.subr.mxu0 %v3839_v1 }
 0xd65   : > { %3615 = vmatprep.mubr.msk.f32.mxu1 %vm3840_vm0, %v3839_v1  ;;  %3623 = vmatprep.subr.mxu1 %v3839_v1 }
 0xe22   : > { %v2222_v53 = vpop.f32.mrf.mxu0  ;;  %v2308_v56 = vpop.f32.mrf.mxu1 }
 0xe23   : > { %v2312_v57 = vsel %vm990_vm10, %v2308_v56, -inf  ;;  %v2226_v58 = vsel %vm990_vm10, %v2222_v53, -inf }
 0xe24   : > { %2313 = vmax.xlane.f32.xlu0 %v2312_v57  ;;  %v3602_v48 = vpop.f32.mrf.mxu0  ;;  %v3607_v47 = vpop.f32.mrf.mxu1 }
 0xe28   : > { %2227 = vmax.xlane.f32.xlu0 %v2226_v58 }
 0xead   : > { %v2314_v59 = vpop.xlane.xlu0 %2313 }
 0xeae   : > { %v2315_v60 = vsub.f32 %v2308_v56, %v2314_v59 }
 0xeb0   : > { %v2316_v61 = vmul.f32 1.442695, %v2315_v60  ;;  %v3281_v60 = vld [vmem:[%s4604_s10 + $0x1] ss:$0 sm:$0xff] }
 0xeb1   : > { %v2228_v7 = vpop.xlane.xlu0 %2227 }
 0xeb2   : > { %3755 = vpow2.f32 %v2316_v61  ;;  %v2229_v8 = vsub.f32 %v2222_v53, %v2228_v7 }
 0xeb4   : > { %v2230_v11 = vmul.f32 1.442695, %v2229_v8  ;;  %v3289_v8 = vld [vmem:[%s4607_s13 + $0x38] sm:$0xff] }
 0xebf   : > { %v3756_v62 = vpop.eup %3755 }
 0xec0   : > { %v2318_v63 = vsel %vm990_vm10, %v3756_v62, 0.0 }
 0xec1   : > { %2319 = vadd.xlane.f32.xlu1 %v2318_v63 }
 0xf4a   : > { %v2320_v0 = vpop.xlane.xlu1 %2319 }
 0xf4b   : > { %3757 = vrcp.f32 %v2320_v0 }
 0xf4c   : > { %3759 = vpow2.f32 %v2230_v11  ;;  %v3287_v11 = vld [vmem:[%s4607_s13 + $0x28] sm:$0xff] }
 0xf58   : > { %v3758_v3 = vpop.eup %3757 }
 0xf59   : > { %v2322_v4 = vmul.f32 %v3758_v3, %v3756_v62  ;;  %v3760_v19 = vpop.eup %3759 }
 0xf5a   : > { %v2232_v21 = vsel %vm990_vm10, %v3760_v19, 0.0 }
 0xf5b   : > { %3611 = vmatmul.mubr.msk.f32.vlgmr.msra.gmra.mxu0 %vm1089_vm11, %v2322_v4 }
 0xf5c   : > { %3619 = vmatpush3.xpose.msk.msra.mxu0 %vm559_vm1, %v2070_v49  ;;  %3620 = vmatprep.mubr.msk.f32.mxu0 %vm3840_vm0, %v3839_v1 }
 0xf5d   : > { %3628 = vmatprep.subr.mxu0 %v3839_v1 }
 0xf5f   : > { %3621 = vmatmul.mubr.msk.f32.vlgmr.msra.gmra.mxu0 %vm559_vm1, %v2476_v5 }
 0xf60   : > { %3629 = vmatpush3.xpose.msk.msra.mxu0 %vm559_vm1, %v2070_v49  ;;  %3630 = vmatprep.mubr.msk.f32.mxu0 %vm3840_vm0, %v3839_v1 }
 0xf61   : > { %3638 = vmatprep.subr.mxu0 %v3839_v1 }
 0xf63   : > { %3631 = vmatmul.mubr.msk.f32.vlgmr.msra.gmra.mxu0 %vm559_vm1, %v2639_v6 }
 0xf64   : > { %3654 = vmatprep.mubr.msk.f32.mxu0 %vm3840_vm0, %v3839_v1  ;;  %3639 = vmatpush3.msra.mxu0 %v3278_v37 }
 0xf65   : > { %3640 = vmatprep.subr.mxu0 %v3839_v1 }
 0xf66   : > { %3641 = vmatpush3.msra.mxu0 %v3277_v38 }
 0xf67   : > { %3642 = vmatprep.subr.mxu0 %v3839_v1 }
 0xf68   : > { %3643 = vmatpush3.msra.mxu0 %v3276_v10 }
 0xf69   : > { %3644 = vmatprep.subr.mxu0 %v3839_v1 }
 0xf6a   : > { %3645 = vmatpush3.msra.mxu0 %v3275_v39 }
 0xf6b   : > { %3646 = vmatprep.subr.mxu0 %v3839_v1 }
 0xf6c   : > { %3647 = vmatpush3.msra.mxu0 %v3274_v12 }
 0xf6d   : > { %3648 = vmatprep.subr.mxu0 %v3839_v1 }
 0xf6e   : > { %3649 = vmatpush3.msra.mxu0 %v3273_v43 }
 0xf6f   : > { %3650 = vmatprep.subr.mxu0 %v3839_v1 }
 0xf70   : > { %3651 = vmatpush3.msra.mxu0 %v3272_v52 }
 0xf71   : > { %3652 = vmatprep.subr.mxu0 %v3839_v1 }
 0xf72   : > { %3653 = vmatpush3.msra.mxu0 %v3271_v54 }
0x101b   : > { %v4426_v13 = vpop.f32.mrf.mxu0 }
0x101d   : > { %v3612_v14 = vpop.f32.mrf.mxu0 }
0x101f   : > { %v2546_v16 = vpop.f32.mrf.mxu0 }
0x1020   : > { %v2550_v17 = vsel %vm990_vm10, %v2546_v16, -inf }
0x1021   : > { %2551 = vmax.xlane.f32.xlu1 %v2550_v17  ;;  %v3622_v18 = vpop.f32.mrf.mxu0 }
0x1022   : > { %v3284_v18 = vld [vmem:[%s4605_s11 + $0x1] ss:$0 sm:$0xff] }
0x1023   : > { %v2709_v20 = vpop.f32.mrf.mxu0 }
0x1024   : > { %v2713_v22 = vsel %vm990_vm10, %v2709_v20, -inf }
0x1025   : > { %2233 = vadd.xlane.f32.xlu1 %v2232_v21  ;;  %2714 = vmax.xlane.f32.xlu0 %v2713_v22  ;;  %v3632_v9 = vpop.f32.mrf.mxu0  ;;  %v3285_v21 = vld [vmem:[%s4606_s12 + $0x1] ss:$0 sm:$0xff] }
0x10aa   : > { %v2552_v23 = vpop.xlane.xlu1 %2551 }
0x10ab   : > { %v2553_v24 = vsub.f32 %v2546_v16, %v2552_v23  ;;  %v3300_v23 = vld [vmem:[%s4609_s15 + $0x78] sm:$0xff] }
0x10ad   : > { %v2554_v25 = vmul.f32 1.442695, %v2553_v24  ;;  %v3299_v24 = vld [vmem:[%s4609_s15 + $0x70] sm:$0xff] }
0x10ae   : > { %v2234_v26 = vpop.xlane.xlu1 %2233  ;;  %v2715_v27 = vpop.xlane.xlu0 %2714 }
0x10af   : > { %3761 = vpow2.f32 %v2554_v25  ;;  %v2716_v28 = vsub.f32 %v2709_v20, %v2715_v27  ;;  %v3298_v25 = vld [vmem:[%s4609_s15 + $0x68] sm:$0xff]  ;;  %v3296_v27 = vld [vmem:[%s4609_s15 + $0x58] sm:$0xff] }
0x10b0   : > { %3763 = vrcp.f32 %v2234_v26  ;;  %v3297_v26 = vld [vmem:[%s4609_s15 + $0x60] sm:$0xff] }
0x10b1   : > { %v2717_v29 = vmul.f32 1.442695, %v2716_v28  ;;  %v3295_v28 = vld [vmem:[%s4609_s15 + $0x50] sm:$0xff] }
0x10b3   : > { %3765 = vpow2.f32 %v2717_v29  ;;  %v3294_v29 = vld [vmem:[%s4609_s15 + $0x48] sm:$0xff] }
0x10bc   : > { %v3762_v30 = vpop.eup %3761 }
0x10bd   : > { %v3764_v31 = vpop.eup %3763  ;;  %v2556_v32 = vsel %vm990_vm10, %v3762_v30, 0.0 }
0x10be   : > { %2557 = vadd.xlane.f32.xlu0 %v2556_v32  ;;  %v2236_v33 = vmul.f32 %v3764_v31, %v3760_v19  ;;  %v3291_v31 = vld [vmem:[%s4608_s14 + $0x1] ss:$0 sm:$0xff] }
0x10c0   : > { %v3766_v34 = vpop.eup %3765  ;;  %3616 = vmatmul.mubr.msk.f32.vlgmr.msra.gmra.mxu1 %vm1089_vm11, %v2236_v33 }
0x10c1   : > { %3624 = vmatpush3.msk.msra.mxu1 %vm1093_vm9, %v2561_v35  ;;  %v2719_v36 = vsel %vm990_vm10, %v3766_v34, 0.0  ;;  %3625 = vmatprep.mubr.msk.f32.mxu1 %vm3840_vm0, %v3839_v1 }
0x10c2   : > { %2720 = vadd.xlane.f32.xlu1 %v2719_v36  ;;  %3633 = vmatprep.subr.mxu1 %v3839_v1 }
0x1147   : > { %v2558_v40 = vpop.xlane.xlu0 %2557 }
0x1148   : > { %3767 = vrcp.f32 %v2558_v40 }
0x114b   : > { %v2721_v41 = vpop.xlane.xlu1 %2720 }
0x114c   : > { %3769 = vrcp.f32 %v2721_v41 }
0x1155   : > { %v3768_v42 = vpop.eup %3767 }
0x1156   : > { %v2560_v44 = vmul.f32 %v3768_v42, %v3762_v30  ;;  %v3293_v30 = vld [vmem:[%s4609_s15 + $0x40] sm:$0xff] }
0x1158   : > { %3626 = vmatmul.mubr.msk.f32.vlgmr.msra.gmra.mxu1 %vm1089_vm11, %v2560_v44 }
0x1159   : > { %v3770_v46 = vpop.eup %3769  ;;  %3634 = vmatpush3.msk.msra.mxu1 %vm1093_vm9, %v2724_v45  ;;  %3635 = vmatprep.mubr.msk.f32.mxu1 %vm3840_vm0, %v3839_v1 }
0x115a   : > { %v2723_v49 = vmul.f32 %v3770_v46, %v3766_v34  ;;  %3657 = vmatprep.subr.mxu1 %v3839_v1 }
0x115c   : > { %3636 = vmatmul.mubr.msk.f32.vlgmr.msra.gmra.mxu1 %vm1089_vm11, %v2723_v49 }
0x115d   : > { %3665 = vmatprep.mubr.msk.f32.mxu1 %vm3840_vm0, %v3839_v1  ;;  %3658 = vmatpush3.msra.mxu1 %v3289_v8 }
0x115e   : > { %3659 = vmatprep.subr.mxu1 %v3839_v1 }
0x1180   : > { %v2472_v50 = vpop.f32.mrf.mxu1 }
0x1181   : > { %v2473_v53 = vadd.f32 %v2472_v50, %v4426_v13  ;;  %v3286_v13 = vld [vmem:[%s4607_s13 + $0x20] sm:$0xff] }
0x1182   : > { %v3617_v51 = vpop.f32.mrf.mxu1 }
0x1218   : > { %v2634_v55 = vpop.f32.mrf.mxu1 }
0x1219   : > { %v2638_v57 = vadd.f32 %v2634_v55, %v2473_v53 }
0x121a   : > { %v3627_v56 = vpop.f32.mrf.mxu1 }
0x121c   : > { %v2797_v48 = vpop.f32.mrf.mxu1 }
0x121d   : > { %v2801_v47 = vadd.f32 %v2797_v48, %v2638_v57 }
0x121e   : > { %v3637_v58 = vpop.f32.mrf.mxu1 }
0x121f   : > { %3655 = vmatmul.mubr.msk.f32.vlgmr.msra.gmra.mxu0 %vm559_vm1, %v2801_v47  ;;  %v3303_v58 = vld [vmem:[%s4610_s16 + $0x1] ss:$0 sm:$0xff] }
0x12df   : > { %v2880_v59 = vpop.f32.mrf.mxu0 }
0x12e0   : > { %v2884_v61 = vadd.f32 %v2880_v59, %v4311_v15  ;;  %v3288_v15 = vld [vmem:[%s4607_s13 + $0x30] sm:$0xff] }
0x12e1   : > { %v3656_v62 = vpop.f32.mrf.mxu0  ;;  %3660 = vmatpush3.msra.mxu1 %v3288_v15 }
0x12e2   : > { %v4489_v63 = vadd.f32 %v3281_v60, %v2884_v61  ;;  %3661 = vmatprep.subr.mxu1 %v3839_v1 }
0x12e3   : > { %3662 = vmatpush3.msra.mxu1 %v3287_v11 }
0x12e4   : > { %v2898_v0 = vsel %vm657_vm3, %v4489_v63, 0.0  ;;  %3663 = vmatprep.subr.mxu1 %v3839_v1 }
0x12e5   : > { %2899 = vadd.xlane.f32.xlu0 %v2898_v0  ;;  %3664 = vmatpush3.msra.mxu1 %v3286_v13 }
0x12e6   : > { %3668 = vmatprep.subr.mxu1 %v3839_v1 }
0x136e   : > { %v2900_v3 = vpop.xlane.xlu0 %2899 }
0x136f   : > { %v2901_v4 = vmul.f32 0.03125, %v2900_v3 }
0x1371   : > { %v2902_v5 = vsub.f32 %v4489_v63, %v2901_v4 }
0x1373   : > { %v2903_v6 = vmul.f32 %v2902_v5, %v2902_v5 }
0x1375   : > { %v2904_v7 = vsel %vm657_vm3, %v2903_v6, 0.0  ;;  %vm3130_vm3 = vcmask 253952  }
0x1376   : > { %2905 = vadd.xlane.f32.xlu1 %v2904_v7 }
0x13ff   : > { %v2906_v14 = vpop.xlane.xlu1 %2905 }
0x1400   : > { %v2907_v16 = vmul.f32 0.03125, %v2906_v14 }
0x1402   : > { %v2908_v17 = vadd.f32 1e-05, %v2907_v16 }
0x1404   : > { %3771 = vrsqrt.f32 %v2908_v17 }
0x1411   : > { %v3772_v19 = vpop.eup %3771 }
0x1412   : > { %v2910_v20 = vmul.f32 %v3772_v19, %v2902_v5 }
0x1414   : > { %v2917_v22 = vmul.f32 %v3284_v18, %v2910_v20 }
0x1416   : > { %v2924_v9 = vadd.f32 %v3285_v21, %v2917_v22 }
0x1418   : > { %3666 = vmatmul.mubr.msk.f32.vlgmr.msra.gmra.mxu1 %vm690_vm4, %v2924_v9 }
0x1419   : > { %3684 = vmatprep.mubr.msk.f32.mxu1 %vm3840_vm0, %v3839_v1  ;;  %3669 = vmatpush3.msra.mxu1 %v3300_v23 }
0x141a   : > { %3670 = vmatprep.subr.mxu1 %v3839_v1 }
0x141b   : > { %3671 = vmatpush3.msra.mxu1 %v3299_v24 }
0x141c   : > { %3672 = vmatprep.subr.mxu1 %v3839_v1 }
0x141d   : > { %3673 = vmatpush3.msra.mxu1 %v3298_v25 }
0x141e   : > { %3674 = vmatprep.subr.mxu1 %v3839_v1 }
0x141f   : > { %3675 = vmatpush3.msra.mxu1 %v3297_v26 }
0x1420   : > { %3676 = vmatprep.subr.mxu1 %v3839_v1 }
0x1421   : > { %3677 = vmatpush3.msra.mxu1 %v3296_v27 }
0x1422   : > { %3678 = vmatprep.subr.mxu1 %v3839_v1 }
0x1423   : > { %3679 = vmatpush3.msra.mxu1 %v3295_v28 }
0x1424   : > { %3680 = vmatprep.subr.mxu1 %v3839_v1 }
0x1425   : > { %3681 = vmatpush3.msra.mxu1 %v3294_v29 }
0x1426   : > { %3682 = vmatprep.subr.mxu1 %v3839_v1 }
0x1427   : > { %3683 = vmatpush3.msra.mxu1 %v3293_v30 }
0x14d8   : > { %v3007_v32 = vpop.f32.mrf.mxu1 }
0x14d9   : > { %v3008_v33 = vadd.f32 %v3291_v31, %v3007_v32 }
0x14da   : > { %v3667_v34 = vpop.f32.mrf.mxu1 }
0x14db   : > { %v3012_v35 = vmul.f32 0.70710677, %v3008_v33  ;;  %v3011_v56 = vmul.f32 0.5, %v3008_v33 }
0x14dd   : > { %v3015_v36 = vand.u32 2147483647, %v3012_v35  ;;  %vm3013_vm0 = vcmp.lt.f32.partialorder %v3012_v35, 0.0 }
0x14de   : > { %v3014_v55 = vsel %vm3013_vm0, -1.0, %v3841_v2 }
0x14df   : > { %v3016_v37 = vmul.f32 0.3275911, %v3015_v36  ;;  %v3029_v10 = vsub.f32 0.0, %v3015_v36 }
0x14e1   : > { %v3017_v38 = vadd.f32 1.0, %v3016_v37  ;;  %v3030_v39 = vmul.f32 %v3029_v10, %v3015_v36 }
0x14e3   : > { %3773 = vrcp.f32 %v3017_v38  ;;  %v3031_v42 = vmul.f32 1.442695, %v3030_v39 }
0x14e5   : > { %3775 = vpow2.f32 %v3031_v42 }
0x14f0   : > { %v3774_v40 = vpop.eup %3773 }
0x14f1   : > { %v3020_v41 = vmul.f32 1.0614054, %v3774_v40 }
0x14f2   : > { %v3776_v43 = vpop.eup %3775 }
0x14f3   : > { %v3021_v44 = vadd.f32 -1.4531521, %v3020_v41 }
0x14f5   : > { %v3022_v1 = vmul.f32 %v3774_v40, %v3021_v44 }
0x14f7   : > { %v3023_v45 = vadd.f32 1.4214138, %v3022_v1 }
0x14f9   : > { %v3024_v46 = vmul.f32 %v3774_v40, %v3023_v45 }
0x14fb   : > { %v3025_v49 = vadd.f32 -0.28449672, %v3024_v46 }
0x14fd   : > { %v3026_v50 = vmul.f32 %v3774_v40, %v3025_v49 }
0x14ff   : > { %v3027_v51 = vadd.f32 0.2548296, %v3026_v50 }
0x1501   : > { %v3028_v12 = vmul.f32 %v3774_v40, %v3027_v51 }
0x1503   : > { %v3033_v52 = vmul.f32 %v3776_v43, %v3028_v12 }
0x1505   : > { %v3034_v54 = vsub.f32 1.0, %v3033_v52 }
0x1507   : > { %v3035_v53 = vmul.f32 %v3034_v54, %v3014_v55 }
0x1509   : > { %v3036_v57 = vadd.f32 1.0, %v3035_v53 }
0x150b   : > { %v3037_v48 = vmul.f32 %v3036_v57, %v3011_v56 }
0x150d   : > { %3685 = vmatmul.mubr.msk.f32.vlgmr.msra.gmra.mxu1 %vm559_vm1, %v3037_v48 }
0x15cd   : > { %v3116_v47 = vpop.f32.mrf.mxu1 }
0x15ce   : > { %v3120_v59 = vadd.f32 %v3116_v47, %v4489_v63 }
0x15cf   : > { %v3686_v60 = vpop.f32.mrf.mxu1 }
0x15d0   : > { %v3129_v2 = vadd.f32 %v3303_v58, %v3120_v59 }
0x15d2   : > { %3131 = vst.msk [vmem:[%s538_s26] sm:$0x1] %vm3130_vm3, %v3129_v2 }
0x15d3   : > { %3790 = shalt.err (!%p3787_p3)
}
0x15d4   : > { %s3791_s2 = scalar_lea.hbm %s3143_s27, 16  ;;  %s3795_s26 = scalar_lea.hbm %s4611_s17, 32 }
0x15d5   : > { %p3792_p4 = scmp.ne.s32.totalorder %s3143_s27, %s3791_s2  ;;  %p3796_p9 = scmp.lt.s32.totalorder %s3143_s27, %s4611_s17 }
0x15d6   : > { %p3797_p10 = scmp.lt.s32.totalorder %s3795_s26, %s3791_s2 }
0x15d7   : > { %p3793_p7 = pnand %p3792_p4, %p3971_p5 }
0x15d8   : > { %p3798_p11 = por %p3797_p10, %p3796_p9 }
0x15d9   : > { %p3794_p8 = pneg %p3793_p7 }
0x15db   : > { %p3799_p12 = pnand %p3798_p11, %p3794_p8 }
0x15dd   : > { %3802 = shalt.err (!%p3799_p12)
}
0x15de   : > { %3687 = dma.vmem_to_hbm [thread:$0]  (%p3971_p5), %s3146_s19, 16, %s3143_s27, %s3133_s0  }
0x15df PF: > { %s4639_s20 = sld [smem:[#allocation7_spill]] }
0x15e0   : > { %s4640_s28 = sld [smem:[#allocation5_spill]] }
0x15e5   : > { %p3693_p13 = scmp.ge.s32.totalorder %s4639_s20, 2 }
0x15e6   : > { %s3157_s29 = sand.u32 1, %s4640_s28  }
0x15e7   : > { %p3690_p0 = pnand %p3693_p13, %p3975_p6  ;;  %s3158_s18 = scalar_lea.sflag [#allocation3], %s3157_s29 }
0x15e9   : > { %p3691_p1 = pneg %p3690_p0 }
0x15eb   : > { %3820 = dma.done.wait (%p3691_p1), %s3158_s18, 16  }
0x15ec   : > { %3822 = vsyncadd (%p3691_p1), %s3158_s18, 4294967280  ;;  %s4642_s27 = sld [smem:[#allocation8_spill]]  ;;  %s4645_s24 = smov %s3829_s25 }
0x15ed   : > { %s4643_s2 = sld [smem:[#allocation6_spill]] }
0x15ee   : > { %s4644_s26 = sld [smem:[#allocation9_spill]] }
0x15f2   : > { %p27_p2 = scmp.ge.s32.totalorder %s4642_s27, 4  }
0x15f3   : > { %s4646_s25 = smov %s4643_s2 }
0x15f4   :  { %29 = sbr.rel (!%p27_p2) target bundleno = 7 (0x7), region = 136 }
0x15f9   :  { %3162 = vsyncpa [#allocation3], 1 }
0x15fa   :  { %3164 = vsyncpa [#allocation3 + $0x1], 1 }

</bundles_post_ra>
